<compile_context>
chip_gen: v7x
topology: tpu7x:2x2x1
jax: 0.10.0
libtpu: 0.0.40
codegen_flags: <defaults>
</compile_context>

<pallas_src>
import jax
import jax.numpy as jnp
from jax.experimental import pallas as pl
from jax.experimental.pallas import tpu as pltpu


def _fm_loss_kernel(t_ref, x_ref, noise_ref, w_ref, b_ref, wt_ref,
                    loss_ref, xnoisy_ref, acc_ref):
    j = pl.program_id(0)
    n_tiles = pl.num_programs(0)
    tn = w_ref.shape[1]

    # One-time work: q_sample into a bf16 VMEM scratch + zero the accumulator.
    @pl.when(j == 0)
    def _():
        t = t_ref[...]                # (B, 1) f32
        x = x_ref[...]                # (B, D) f32
        noise = noise_ref[...]        # (B, D) f32
        # q_sample: x_noisy = x_start * (1 - t) + noise * t  (f32 VPU, bf16 store)
        xnoisy_ref[...] = (x * (1.0 - t) + noise * t).astype(xnoisy_ref.dtype)
        acc_ref[...] = jnp.zeros_like(acc_ref)

    # Synthetic velocity model for this output tile: bf16 x_noisy @ bf16 W on the
    # MXU with f32 accumulation, plus bias and time conditioning.
    out = jnp.dot(xnoisy_ref[...], w_ref[...],
                  preferred_element_type=jnp.float32)          # (B, tn) f32
    out = out + (b_ref[...] + t_ref[...] * wt_ref[...])

    # Flow-matching target = noise - x_start, restricted to this output tile
    # (aligned static-size slice of the resident (B, D) slabs — no extra DMA).
    start = pl.multiple_of(j * tn, tn)
    target = noise_ref[:, pl.ds(start, tn)] - x_ref[:, pl.ds(start, tn)]

    # Per-step epilogue: pure VPU add into the vector accumulator (no reduce).
    diff = target - out
    acc_ref[...] += diff * diff

    # Single cross-lane reduce + normalize at the last tile -> mean squared error.
    @pl.when(j == n_tiles - 1)
    def _():
        total = x_ref.shape[0] * x_ref.shape[1]
        loss_ref[0, 0] = jnp.sum(acc_ref[...]) / jnp.float32(total)


def flow_matching_loss(x_start, t, noise, w, b, wt, *, tn=512):
    """x_start/noise: (B, C, H, W) NCHW; t: (B,); w: (D, D); b, wt: (D,)."""
    B = x_start.shape[0]
    x2 = x_start.reshape(B, -1).astype(jnp.float32)
    n2 = noise.reshape(B, -1).astype(jnp.float32)
    D = x2.shape[1]
    assert D % tn == 0 and tn % 128 == 0
    t2 = t.reshape(B, 1).astype(jnp.float32)
    b2 = b.reshape(1, D).astype(jnp.float32)
    wt2 = wt.reshape(1, D).astype(jnp.float32)
    # The (D, D) weight is the dominant HBM stream: bf16 halves DMA traffic and
    # matches the native MXU input width on v5e / v6e / v7x.
    w_bf16 = w.astype(jnp.bfloat16)

    loss = pl.pallas_call(
        _fm_loss_kernel,
        out_shape=jax.ShapeDtypeStruct((1, 1), jnp.float32),
        grid_spec=pltpu.PrefetchScalarGridSpec(
            num_scalar_prefetch=0,
            grid=(D // tn,),
            in_specs=[
                pl.BlockSpec((B, 1), lambda j: (0, 0)),    # t (resident)
                pl.BlockSpec((B, D), lambda j: (0, 0)),    # x_start flat (resident)
                pl.BlockSpec((B, D), lambda j: (0, 0)),    # noise   flat (resident)
                pl.BlockSpec((D, tn), lambda j: (0, j)),   # bf16 weight tile (streamed)
                pl.BlockSpec((1, tn), lambda j: (0, j)),   # model bias tile
                pl.BlockSpec((1, tn), lambda j: (0, j)),   # time-embedding tile
            ],
            out_specs=pl.BlockSpec(memory_space=pltpu.MemorySpace.SMEM),
            scratch_shapes=[
                pltpu.VMEM((B, D), jnp.bfloat16),   # x_noisy, computed once at j == 0
                pltpu.VMEM((B, tn), jnp.float32),   # squared-error vector accumulator
            ],
        ),
        compiler_params=pltpu.CompilerParams(
            dimension_semantics=("arbitrary",),
            vmem_limit_bytes=32 << 20,   # explicit budget; actual use ~3 MiB
        ),
    )(t2, x2, n2, w_bf16, b2, wt2)
    return loss[0, 0]


def reference_loss(x_start, t, noise, w, b, wt):
    """Pure-JAX reference mirroring the kernel's synthetic bf16-weight model."""
    B = x_start.shape[0]
    x2 = x_start.reshape(B, -1).astype(jnp.float32)
    n2 = noise.reshape(B, -1).astype(jnp.float32)
    t2 = t.reshape(B, 1).astype(jnp.float32)
    x_noisy = (x2 * (1.0 - t2) + n2 * t2).astype(jnp.bfloat16)
    out = jnp.dot(x_noisy, w.astype(jnp.bfloat16),
                  preferred_element_type=jnp.float32)
    out = out + b[None, :] + t2 * wt[None, :]
    target = n2 - x2
    return jnp.mean((target - out) ** 2)


if __name__ == "__main__":
    B, C, H, W = 2, 4, 16, 16
    D = C * H * W  # 1024

    key = jax.random.PRNGKey(0)
    k_x, k_t, k_n, k_w, k_wt = jax.random.split(key, 5)

    x_start = jax.random.normal(k_x, (B, C, H, W), dtype=jnp.float32)
    # time sampler: continuous uniform in [0, 1)
    t = jax.random.uniform(k_t, (B,), dtype=jnp.float32)
    noise = jax.random.normal(k_n, (B, C, H, W), dtype=jnp.float32)

    # deterministic synthetic model parameters
    w = 0.02 * jax.random.normal(k_w, (D, D), dtype=jnp.float32)
    b = jnp.zeros((D,), dtype=jnp.float32)
    wt = 0.02 * jax.random.normal(k_wt, (D,), dtype=jnp.float32)

    loss = flow_matching_loss(x_start, t, noise, w, b, wt)
    loss = jax.block_until_ready(loss)

    ref = reference_loss(x_start, t, noise, w, b, wt)
    assert jnp.allclose(loss, ref, rtol=5e-3, atol=1e-4), (loss, ref)

    print("KERNEL_OK")
</pallas_src>

<mosaic_0001>
module attributes {stable_mosaic.version = 11 : i64} {
  func.func @_fm_loss_kernel(%arg0: i32, %arg1: memref<2x1xf32, #tpu.memory_space<vmem>>, %arg2: memref<2x1024xf32, #tpu.memory_space<vmem>>, %arg3: memref<2x1024xf32, #tpu.memory_space<vmem>>, %arg4: memref<1024x512xbf16, #tpu.memory_space<vmem>>, %arg5: memref<1x512xf32, #tpu.memory_space<vmem>>, %arg6: memref<1x512xf32, #tpu.memory_space<vmem>>, %arg7: memref<1x1xf32, #tpu.memory_space<smem>>, %arg8: memref<2x1024xbf16, #tpu.memory_space<vmem>>, %arg9: memref<2x512xf32, #tpu.memory_space<vmem>>) attributes {dimension_semantics = [#tpu.dimension_semantics<arbitrary>], iteration_bounds = array<i64: 2>, scalar_prefetch = 0 : i64, scratch_operands = 2 : i64, tpu.core_type = #tpu.core_type<tc>, window_params = [{pipeline_mode = #tpu.pipeline_mode<synchronous>, transform_indices = @transform_0, window_bounds = array<i64: 2, 1>}, {pipeline_mode = #tpu.pipeline_mode<synchronous>, transform_indices = @transform_1, window_bounds = array<i64: 2, 1024>}, {pipeline_mode = #tpu.pipeline_mode<synchronous>, transform_indices = @transform_2, window_bounds = array<i64: 2, 1024>}, {transform_indices = @transform_3, window_bounds = array<i64: 1024, 512>}, {transform_indices = @transform_4, window_bounds = array<i64: 1, 512>}, {transform_indices = @transform_5, window_bounds = array<i64: 1, 512>}, {transform_indices = @transform_6, window_bounds = array<i64: 1, 1>}]} {
    %c0_i32 = arith.constant 0 : i32
    %0 = arith.cmpi eq, %arg0, %c0_i32 : i32
    %1 = arith.extui %0 : i1 to i32
    %c0_i32_0 = arith.constant 0 : i32
    %2 = arith.cmpi ne, %1, %c0_i32_0 : i32
    scf.if %2 {
      %c0_17 = arith.constant 0 : index
      %c0_18 = arith.constant 0 : index
      %30 = vector.load %arg1[%c0_17, %c0_18] : memref<2x1xf32, #tpu.memory_space<vmem>>, vector<2x1xf32>
      %c0_19 = arith.constant 0 : index
      %c0_20 = arith.constant 0 : index
      %31 = vector.load %arg2[%c0_19, %c0_20] : memref<2x1024xf32, #tpu.memory_space<vmem>>, vector<2x1024xf32>
      %c0_21 = arith.constant 0 : index
      %c0_22 = arith.constant 0 : index
      %32 = vector.load %arg3[%c0_21, %c0_22] : memref<2x1024xf32, #tpu.memory_space<vmem>>, vector<2x1024xf32>
      %cst_23 = arith.constant 1.000000e+00 : f32
      %33 = vector.broadcast %cst_23 : f32 to vector<2x1xf32>
      %34 = arith.subf %33, %30 : vector<2x1xf32>
      %35 = vector.broadcast %34 : vector<2x1xf32> to vector<2x1024xf32>
      %36 = arith.mulf %31, %35 : vector<2x1024xf32>
      %37 = vector.broadcast %30 : vector<2x1xf32> to vector<2x1024xf32>
      %38 = arith.mulf %32, %37 : vector<2x1024xf32>
      %39 = arith.addf %36, %38 : vector<2x1024xf32>
      %40 = arith.truncf %39 : vector<2x1024xf32> to vector<2x1024xbf16>
      %c0_24 = arith.constant 0 : index
      %c0_25 = arith.constant 0 : index
      %41 = vector.load %arg8[%c0_24, %c0_25] : memref<2x1024xbf16, #tpu.memory_space<vmem>>, vector<2x1024xbf16>
      tpu.vector_store %arg8[%c0_24, %c0_25], %40 {strides = array<i32>} : memref<2x1024xbf16, #tpu.memory_space<vmem>>, vector<2x1024xbf16>,
      %cst_26 = arith.constant 0.000000e+00 : f32
      %42 = vector.broadcast %cst_26 : f32 to vector<2x512xf32>
      %c0_27 = arith.constant 0 : index
      %c0_28 = arith.constant 0 : index
      %43 = vector.load %arg9[%c0_27, %c0_28] : memref<2x512xf32, #tpu.memory_space<vmem>>, vector<2x512xf32>
      tpu.vector_store %arg9[%c0_27, %c0_28], %42 {strides = array<i32>} : memref<2x512xf32, #tpu.memory_space<vmem>>, vector<2x512xf32>,
    } else {
    }
    %c0 = arith.constant 0 : index
    %c0_1 = arith.constant 0 : index
    %3 = vector.load %arg8[%c0, %c0_1] : memref<2x1024xbf16, #tpu.memory_space<vmem>>, vector<2x1024xbf16>
    %c0_2 = arith.constant 0 : index
    %c0_3 = arith.constant 0 : index
    %4 = vector.load %arg4[%c0_2, %c0_3] : memref<1024x512xbf16, #tpu.memory_space<vmem>>, vector<1024x512xbf16>
    %cst = arith.constant dense<0.000000e+00> : vector<2x512xf32>
    %5 = tpu.matmul %3, %4, %cst {dimension_numbers = #tpu.dot_dimension_numbers<[1], [0], [0], [1], [0, 0, 1, 1], [], []>} : vector<2x1024xbf16>, vector<1024x512xbf16>, vector<2x512xf32> -> vector<2x512xf32>
    %c0_4 = arith.constant 0 : index
    %c0_5 = arith.constant 0 : index
    %6 = vector.load %arg5[%c0_4, %c0_5] : memref<1x512xf32, #tpu.memory_space<vmem>>, vector<1x512xf32>
    %c0_6 = arith.constant 0 : index
    %c0_7 = arith.constant 0 : index
    %7 = vector.load %arg1[%c0_6, %c0_7] : memref<2x1xf32, #tpu.memory_space<vmem>>, vector<2x1xf32>
    %c0_8 = arith.constant 0 : index
    %c0_9 = arith.constant 0 : index
    %8 = vector.load %arg6[%c0_8, %c0_9] : memref<1x512xf32, #tpu.memory_space<vmem>>, vector<1x512xf32>
    %9 = vector.broadcast %7 : vector<2x1xf32> to vector<2x512xf32>
    %10 = vector.broadcast %8 : vector<1x512xf32> to vector<2x512xf32>
    %11 = arith.mulf %9, %10 : vector<2x512xf32>
    %12 = vector.broadcast %6 : vector<1x512xf32> to vector<2x512xf32>
    %13 = arith.addf %12, %11 : vector<2x512xf32>
    %14 = arith.addf %5, %13 : vector<2x512xf32>
    %c512_i32 = arith.constant 512 : i32
    %15 = arith.muli %arg0, %c512_i32 : i32
    %16 = tpu.assume_multiple %15, 512 : i32
    %c0_10 = arith.constant 0 : index
    %17 = arith.index_cast %16 : i32 to index
    %18 = vector.load %arg3[%c0_10, %17] : memref<2x1024xf32, #tpu.memory_space<vmem>>, vector<2x512xf32>
    %c0_11 = arith.constant 0 : index
    %19 = arith.index_cast %16 : i32 to index
    %20 = vector.load %arg2[%c0_11, %19] : memref<2x1024xf32, #tpu.memory_space<vmem>>, vector<2x512xf32>
    %21 = arith.subf %18, %20 : vector<2x512xf32>
    %22 = arith.subf %21, %14 : vector<2x512xf32>
    %c0_12 = arith.constant 0 : index
    %c0_13 = arith.constant 0 : index
    %23 = vector.load %arg9[%c0_12, %c0_13] : memref<2x512xf32, #tpu.memory_space<vmem>>, vector<2x512xf32>
    %24 = arith.mulf %22, %22 : vector<2x512xf32>
    %25 = arith.addf %23, %24 : vector<2x512xf32>
    %c0_14 = arith.constant 0 : index
    %c0_15 = arith.constant 0 : index
    %26 = vector.load %arg9[%c0_14, %c0_15] : memref<2x512xf32, #tpu.memory_space<vmem>>, vector<2x512xf32>
    tpu.vector_store %arg9[%c0_14, %c0_15], %25 {strides = array<i32>} : memref<2x512xf32, #tpu.memory_space<vmem>>, vector<2x512xf32>,
    %c1_i32 = arith.constant 1 : i32
    %27 = arith.cmpi eq, %arg0, %c1_i32 : i32
    %28 = arith.extui %27 : i1 to i32
    %c0_i32_16 = arith.constant 0 : i32
    %29 = arith.cmpi ne, %28, %c0_i32_16 : i32
    scf.if %29 {
      %c0_17 = arith.constant 0 : index
      %c0_18 = arith.constant 0 : index
      %30 = vector.load %arg9[%c0_17, %c0_18] : memref<2x512xf32, #tpu.memory_space<vmem>>, vector<2x512xf32>
      %31 = vector.shape_cast %30 : vector<2x512xf32> to vector<1x2x512xf32>
      %cst_19 = arith.constant dense<0.000000e+00> : vector<1xf32>
      %32 = vector.multi_reduction <add>, %31, %cst_19 [1, 2] : vector<1x2x512xf32> to vector<1xf32>
      %33 = vector.shape_cast %32 : vector<1xf32> to vector<1x1x1xf32>
      %34 = vector.extract %33[0, 0, 0] : f32 from vector<1x1x1xf32>
      %cst_20 = arith.constant 2.048000e+03 : f32
      %35 = arith.divf %34, %cst_20 : f32
      %c0_21 = arith.constant 0 : index
      %c0_22 = arith.constant 0 : index
      %36 = memref.load %arg7[%c0_21, %c0_22] : memref<1x1xf32, #tpu.memory_space<smem>>
      memref.store %35, %arg7[%c0_21, %c0_22] : memref<1x1xf32, #tpu.memory_space<smem>>
    } else {
    }
    return
  }
  func.func @transform_0(%arg0: i32) -> (i32, i32) {
    %c0_i32 = arith.constant 0 : i32
    %c0_i32_0 = arith.constant 0 : i32
    %c0_i32_1 = arith.constant 0 : i32
    return %c0_i32, %c0_i32_0 : i32, i32
  }
  func.func @transform_1(%arg0: i32) -> (i32, i32) {
    %c0_i32 = arith.constant 0 : i32
    %c0_i32_0 = arith.constant 0 : i32
    %c0_i32_1 = arith.constant 0 : i32
    return %c0_i32, %c0_i32_0 : i32, i32
  }
  func.func @transform_2(%arg0: i32) -> (i32, i32) {
    %c0_i32 = arith.constant 0 : i32
    %c0_i32_0 = arith.constant 0 : i32
    %c0_i32_1 = arith.constant 0 : i32
    return %c0_i32, %c0_i32_0 : i32, i32
  }
  func.func @transform_3(%arg0: i32) -> (i32, i32) {
    %c0_i32 = arith.constant 0 : i32
    %c0_i32_0 = arith.constant 0 : i32
    return %c0_i32, %arg0 : i32, i32
  }
  func.func @transform_4(%arg0: i32) -> (i32, i32) {
    %c0_i32 = arith.constant 0 : i32
    %c0_i32_0 = arith.constant 0 : i32
    return %c0_i32, %arg0 : i32, i32
  }
  func.func @transform_5(%arg0: i32) -> (i32, i32) {
    %c0_i32 = arith.constant 0 : i32
    %c0_i32_0 = arith.constant 0 : i32
    return %c0_i32, %arg0 : i32, i32
  }
  func.func @transform_6(%arg0: i32) -> (i32, i32) {
    %c0_i32 = arith.constant 0 : i32
    %c0_i32_0 = arith.constant 0 : i32
    %c0_i32_1 = arith.constant 0 : i32
    return %c0_i32, %c0_i32_0 : i32, i32
  }
}

</mosaic_0001>

<bundles_post_ra>
// kernel: tpu_custom_call.1
= control target key start
LH: loop header
LB: loop body
LE: loop exit
PB: predicated region body
PF: predicated region fallthrough
CT: control target
= control target key end

     0   :  { %s4304_s0 = inlined_call_operand.vmem [shape: f32[2,1], index: 0, kind: input, shape index: {}]   ;;  %s4305_s1 = inlined_call_operand.hbm [shape: f32[2,1024], index: 1, kind: input, shape index: {}]   ;;  %s4306_s2 = inlined_call_operand.hbm [shape: f32[2,1024], index: 2, kind: input, shape index: {}]   ;;  %s4307_s3 = inlined_call_operand.hbm [shape: bf16[1024,1024], index: 3, kind: input, shape index: {}]   ;;  %s4308_s4 = inlined_call_operand.hbm [shape: f32[1,1024], index: 4, kind: input, shape index: {}]   ;;  %s4309_s5 = inlined_call_operand.hbm [shape: f32[1,1024], index: 5, kind: input, shape index: {}]   ;;  %s4310_s6 = inlined_call_operand.hbm [shape: f32[1,1], index: 6, kind: output, shape index: {}]  }
   0x1   :  { %4321 = sst [smem:[#allocation17_spill]] %s4305_s1 }
   0x2   :  { %4322 = sst [smem:[#allocation18_spill]] %s4307_s3 }
   0x3   :  { %11 = vsyncpa [#allocation5], 0 }
   0x4   :  { %12 = vsyncpa [#allocation8], 0 }
   0x5   :  { %13 = vsyncpa [#allocation6], 0  ;;  %s3748_s21 = smov 0   ;;  %s3750_s22 = smov 0  }
   0x6   :  { %s3752_s23 = smov 0   ;;  %s3754_s24 = smov 0  }
   0x7 LB: > { %s3767_s25 = sadd.s32 4294967295, %s3694_s24   ;;  %s3770_s26 = sadd.s32 1, %s3694_s24   ;;  %s3694_s24 = sphi %s3754_s24, %s4348_s24   ;;  %s3690_s23 = sphi %s3752_s23, %s4347_s23   ;;  %s3686_s22 = sphi %s3750_s22, %s4346_s22   ;;  %s3682_s21 = sphi %s3748_s21, %s4345_s21  }
   0x8   : > { %s86_s27 = ssub.s32 %s3694_s24, %s3770_s26  ;;  %s89_s28 = sadd.s32 1, %s3690_s23 }
   0x9   : > { %p87_p0 = scmp.eq.s32.totalorder %s86_s27, 0  ;;  %p96_p1 = scmp.ne.s32.totalorder %s3690_s23, %s3686_s22 }
   0xa   : > { %p97_p2 = scmp.eq.s32.totalorder %s3694_s24, 0  ;;  %p102_p3 = scmp.ne.s32.totalorder %s3686_s22, %s3682_s21 }
   0xb   : > { %s3780_s29 = scalar_select %p87_p0, %s3690_s23, %s89_s28  }
   0xc   : > { %p3782_p4 = por %p97_p2, %p96_p1  ;;  %p4311_p5 = scmp.eq.s32.totalorder %s3767_s25, 0 }
   0xd   : > { %p2693_p6 = scmp.ge.s32.totalorder %s3694_s24, 1  ;;  %p186_p7 = scmp.lt.s32.totalorder %s3694_s24, 3 }
   0xe   : > { %p3791_p8 = por %p4311_p5, %p102_p3  ;;  %s3696_s9 = smov [#allocation4]  }
   0xf   : > { %p3796_p10 = pnand %p2693_p6, %p186_p7  ;;  %s202_s10 = sshll.u32 %s3696_s9, 4  ;;  %s203_s10 = int_to_ptr.vmem [resolvable:$true] %s202_s10 }
  0x10   : > { %s4324_s7 = scalar_select %p3791_p8, 1, 0 }
  0x11   : > { %s4325_s8 = scalar_select %p3796_p10, 1, 0 }
  0x12   : > { %p3032_p11 = pneg %p3796_p10  ;;  %p3051_p12 = scmp.lt.s32.totalorder %s3694_s24, 2 }
  0x13   : > { %s224_s11 = sand.u32 1, %s3694_s24   ;;  %s226_s14 = sand.u32 1, %s3690_s23  }
  0x14   : > { %p3806_p13 = pnand %p3032_p11, %p4311_p5  ;;  %p3812_p0 = pnand %p3051_p12, %p3782_p4 }
  0x15   : > { %s2697_s15 = sshll.u32 %s226_s14, 11  ;;  %s4328_s1 = sld [smem:[#allocation17_spill]] }
  0x16   : > { %s4326_s12 = scalar_select %p3806_p13, 1, 0 }
  0x17   : > { %s4327_s13 = scalar_select %p3812_p0, 1, 0 }
  0x18   : > { %p4315_p2 = pneg %p3806_p13 }
  0x1b   : > { %s3490_s18 = scalar_lea.hbm %s4328_s1, 256 }
  0x1c   : > { %p3491_p1 = scmp.ne.s32.totalorder %s4328_s1, %s3490_s18  ;;  %p3497_p4 = scmp.lt.u32.totalorder %s3490_s18, %s4328_s1 }
  0x1e   : > { %p3493_p3 = pnand %p4315_p2, %p3491_p1 }
  0x20   : > { %p3494_p6 = pneg %p3493_p3 }
  0x22   : > { %p3499_p7 = pnand %p3497_p4, %p3494_p6 }
  0x24   : > { %3502 = shalt.err (!%p3499_p7)
}
  0x25   : > { %s3503_s28 = scalar_lea.vmem %s203_s10, 256  ;;  %p3511_p5 = scmp.lt.s32.totalorder %s203_s10, %s203_s10 }
  0x26   : > { %p3504_p11 = scmp.ne.s32.totalorder %s203_s10, %s3503_s28  ;;  %p3512_p8 = scmp.lt.s32.totalorder %s3503_s28, %s3503_s28 }
  0x28   : > { %p3506_p12 = pnand %p3504_p11, %p4315_p2  ;;  %p3513_p10 = por %p3512_p8, %p3511_p5 }
  0x2a   : > { %p3507_p9 = pneg %p3506_p12 }
  0x2c   : > { %p3514_p0 = pnand %p3513_p10, %p3507_p9 }
  0x2e   : > { %3517 = shalt.err (!%p3514_p0)
}
  0x2f   : > { %3035 = dma.hbm_to_vmem [thread:$0]  (!%p3806_p13), %s4328_s1, 256, %s203_s10, [#allocation5]  }
  0x30   : > { %s2981_s16 = sshll.u32 %s3694_s24, 8  ;;  %s228_s17 = scalar_lea.vmem [#allocation9], %s2697_s15 }
  0x31   : > { %s235_s18 = sshll.u32 %s228_s17, 4  ;;  %s4329_s3 = sld [smem:[#allocation18_spill]]  ;;  %s3845_s18 = int_to_ptr.vmem [resolvable:$true] %s235_s18 }
  0x32   : > { %s3847_s27 = sshll.u32 %s226_s14, 2  ;;  %s3849_s28 = scalar_lea.sflag [#allocation5], %s224_s11 }
  0x33   : > { %p4330_p8 = scmp.ne.s32.totalorder %s4327_s13, 0 }
  0x35   : > { %p3855_p9 = pneg %p4330_p8 }
  0x37   : > { %s3843_s21 = scalar_lea.hbm %s4329_s3, %s2981_s16  ;;  %s3523_s16 = scalar_lea.hbm %s4329_s3, 65536 }
  0x38   : > { %s3518_s30 = scalar_lea.hbm %s3843_s21, 32768  ;;  %p3524_p1 = scmp.lt.u32.totalorder %s3843_s21, %s4329_s3 }
  0x39   : > { %p3519_p5 = scmp.ne.s32.totalorder %s3843_s21, %s3518_s30  ;;  %p3525_p3 = scmp.lt.u32.totalorder %s3523_s16, %s3518_s30 }
  0x3a   : > { %s4331_s10 = scalar_select %p3855_p9, 1, 0 }
  0x3b   : > { %p3521_p10 = pnand %p3855_p9, %p3519_p5  ;;  %p3526_p6 = por %p3525_p3, %p3524_p1 }
  0x3c   : > { %p3527_p4 = scmp.lt.u32.totalorder %s3518_s30, %s3843_s21 }
  0x3d   : > { %p3522_p0 = pneg %p3521_p10 }
  0x3e   : > { %p3528_p7 = por %p3527_p4, %p3526_p6 }
  0x40   : > { %p3529_p11 = pnand %p3528_p7, %p3522_p0 }
  0x42   : > { %3532 = shalt.err (!%p3529_p11)
}
  0x43   : > { %s3533_s11 = scalar_lea.vmem %s3845_s18, 32768  ;;  %s3697_s19 = smov [#allocation9]  }
  0x44   : > { %p3534_p12 = scmp.ne.s32.totalorder %s3845_s18, %s3533_s11  ;;  %s3538_s20 = sshll.u32 %s3697_s19, 4  ;;  %s3539_s20 = int_to_ptr.vmem [resolvable:$false] %s3538_s20 }
  0x45   : > { %s3540_s15 = scalar_lea.vmem %s3539_s20, 65536  ;;  %p3541_p2 = scmp.lt.s32.totalorder %s3845_s18, %s3539_s20 }
  0x46   : > { %p3536_p5 = pnand %p3534_p12, %p3855_p9  ;;  %p3542_p13 = scmp.lt.s32.totalorder %s3540_s15, %s3533_s11 }
  0x48   : > { %p3537_p10 = pneg %p3536_p5  ;;  %p3543_p1 = por %p3542_p13, %p3541_p2 }
  0x4a   : > { %p3544_p3 = pnand %p3543_p1, %p3537_p10 }
  0x4c   : > { %3547 = shalt.err (!%p3544_p3)
}
  0x4d   : > { %s3698_s30 = smov 512   ;;  %s3699_s9 = smov 256  }
  0x4e   : > { %s3700_s16 = smov 16   ;;  %s2982_s17 = sshll.u32 %s3694_s24, 6 }
  0x4f   : > { %3042 = dma.hbm_to_vmem [thread:$0]  (!%p4330_p8), %s3843_s21, 32768, %s3845_s18, %s3849_s28, %s3698_s30, %s3699_s9, %s3700_s16  }
  0x50   : > { %s3885_s19 = scalar_lea.hbm %s4308_s4, %s2982_s17  ;;  %s249_s20 = scalar_lea.vmem [#allocation10], %s3847_s27 }
  0x51   : > { %s257_s15 = sshll.u32 %s249_s20, 4  ;;  %s3548_s1 = scalar_lea.hbm %s3885_s19, 64  ;;  %s258_s15 = int_to_ptr.vmem [resolvable:$true] %s257_s15 }
  0x52   : > { %p3549_p13 = scmp.ne.s32.totalorder %s3885_s19, %s3548_s1  ;;  %s3553_s30 = scalar_lea.hbm %s4308_s4, 128 }
  0x53   : > { %p3554_p6 = scmp.lt.u32.totalorder %s3885_s19, %s4308_s4  ;;  %p3555_p4 = scmp.lt.u32.totalorder %s3553_s30, %s3548_s1 }
  0x54   : > { %p3551_p2 = pnand %p3549_p13, %p3855_p9  ;;  %p3557_p11 = scmp.lt.u32.totalorder %s3548_s1, %s3885_s19 }
  0x55   : > { %p3556_p7 = por %p3555_p4, %p3554_p6 }
  0x56   : > { %p3552_p0 = pneg %p3551_p2 }
  0x57   : > { %p3558_p12 = por %p3557_p11, %p3556_p7 }
  0x59   : > { %p3559_p5 = pnand %p3558_p12, %p3552_p0 }
  0x5b   : > { %3562 = shalt.err (!%p3559_p5)
}
  0x5c   : > { %s3563_s14 = scalar_lea.vmem %s258_s15, 64  ;;  %s3701_s11 = smov [#allocation10]  }
  0x5d   : > { %p3564_p10 = scmp.ne.s32.totalorder %s258_s15, %s3563_s14  ;;  %s3568_s20 = sshll.u32 %s3701_s11, 4  ;;  %s3569_s20 = int_to_ptr.vmem [resolvable:$false] %s3568_s20 }
  0x5e   : > { %s3570_s18 = scalar_lea.vmem %s3569_s20, 128  ;;  %p3571_p13 = scmp.lt.s32.totalorder %s258_s15, %s3569_s20 }
  0x5f   : > { %p3566_p1 = pnand %p3564_p10, %p3855_p9  ;;  %p3572_p2 = scmp.lt.s32.totalorder %s3570_s18, %s3563_s14 }
  0x61   : > { %p3567_p3 = pneg %p3566_p1  ;;  %p3573_p8 = por %p3572_p2, %p3571_p13 }
  0x63   : > { %p3574_p4 = pnand %p3573_p8, %p3567_p3 }
  0x65   : > { %3577 = shalt.err (!%p3574_p4)
}
  0x66   : > { %p4332_p6 = scmp.ne.s32.totalorder %s4327_s13, 0  ;;  %s3702_s1 = smov [#allocation7]  }
  0x67   : > { %s213_s21 = sshll.u32 %s3702_s1, 4  ;;  %s3911_s16 = scalar_lea.hbm %s4309_s5, %s2982_s17  ;;  %s214_s21 = int_to_ptr.vmem [resolvable:$true] %s213_s21 }
  0x68   : > { %3045 = dma.hbm_to_vmem [thread:$0]  (!%p4332_p6), %s3885_s19, 64, %s258_s15, %s3849_s28  }
  0x69   : > { %s3578_s20 = scalar_lea.hbm %s4306_s2, 256  ;;  %p4333_p0 = scmp.ne.s32.totalorder %s4326_s12, 0 }
  0x6a   : > { %p3579_p8 = scmp.ne.s32.totalorder %s4306_s2, %s3578_s20  ;;  %p3585_p5 = scmp.lt.u32.totalorder %s3578_s20, %s4306_s2 }
  0x6b   : > { %p4334_p7 = pneg %p4333_p0 }
  0x6d   : > { %p3581_p11 = pnand %p3579_p8, %p4334_p7 }
  0x6f   : > { %p3582_p12 = pneg %p3581_p11 }
  0x71   : > { %p3587_p10 = pnand %p3585_p5, %p3582_p12 }
  0x73   : > { %3590 = shalt.err (!%p3587_p10)
}
  0x74   : > { %s3591_s24 = scalar_lea.vmem %s214_s21, 256  ;;  %p4335_p3 = pmov %p4334_p7 }
  0x75   : > { %p3592_p1 = scmp.ne.s32.totalorder %s214_s21, %s3591_s24  ;;  %p3599_p4 = scmp.lt.s32.totalorder %s214_s21, %s214_s21 }
  0x76   : > { %p3600_p6 = scmp.lt.s32.totalorder %s3591_s24, %s3591_s24 }
  0x77   : > { %p3594_p13 = pnand %p3592_p1, %p4335_p3 }
  0x78   : > { %p3601_p9 = por %p3600_p6, %p3599_p4 }
  0x79   : > { %p3595_p2 = pneg %p3594_p13 }
  0x7b   : > { %p3602_p7 = pnand %p3601_p9, %p3595_p2 }
  0x7d   : > { %3605 = shalt.err (!%p3602_p7)
}
  0x7e   : > { %3038 = dma.hbm_to_vmem [thread:$0]  (!%p4333_p0), %s4306_s2, 256, %s214_s21, [#allocation8]  }
  0x7f   : > { %s268_s1 = scalar_lea.vmem [#allocation11], %s3847_s27  ;;  %s3606_s9 = scalar_lea.hbm %s3911_s16, 64 }
  0x80   : > { %s276_s30 = sshll.u32 %s268_s1, 4  ;;  %p3607_p8 = scmp.ne.s32.totalorder %s3911_s16, %s3606_s9  ;;  %s277_s30 = int_to_ptr.vmem [resolvable:$true] %s276_s30 }
  0x81   : > { %p4336_p6 = scmp.ne.s32.totalorder %s4331_s10, 0  ;;  %s3611_s11 = scalar_lea.hbm %s4309_s5, 128 }
  0x82   : > { %p3612_p12 = scmp.lt.u32.totalorder %s3911_s16, %s4309_s5  ;;  %p3613_p5 = scmp.lt.u32.totalorder %s3611_s11, %s3606_s9 }
  0x83   : > { %p3609_p9 = pnand %p3607_p8, %p4336_p6  ;;  %p3615_p1 = scmp.lt.u32.totalorder %s3606_s9, %s3911_s16 }
  0x84   : > { %p3614_p10 = por %p3613_p5, %p3612_p12 }
  0x85   : > { %p3610_p11 = pneg %p3609_p9 }
  0x86   : > { %p3616_p0 = por %p3615_p1, %p3614_p10 }
  0x88   : > { %p3617_p3 = pnand %p3616_p0, %p3610_p11 }
  0x8a   : > { %3620 = shalt.err (!%p3617_p3)
}
  0x8b   : > { %s3621_s27 = scalar_lea.vmem %s277_s30, 64  ;;  %s3703_s21 = smov [#allocation11]  }
  0x8c   : > { %p3622_p13 = scmp.ne.s32.totalorder %s277_s30, %s3621_s27  ;;  %s3626_s19 = sshll.u32 %s3703_s21, 4  ;;  %s3627_s19 = int_to_ptr.vmem [resolvable:$false] %s3626_s19 }
  0x8d   : > { %s3628_s15 = scalar_lea.vmem %s3627_s19, 128  ;;  %p3629_p7 = scmp.lt.s32.totalorder %s277_s30, %s3627_s19 }
  0x8e   : > { %p3624_p2 = pnand %p3622_p13, %p4336_p6  ;;  %p3630_p8 = scmp.lt.s32.totalorder %s3628_s15, %s3621_s27 }
  0x90   : > { %p3625_p4 = pneg %p3624_p2  ;;  %p3631_p9 = por %p3630_p8, %p3629_p7 }
  0x92   : > { %p3632_p5 = pnand %p3631_p9, %p3625_p4 }
  0x94   : > { %3635 = shalt.err (!%p3632_p5)
}
  0x95   : > { %p4337_p12 = scmp.ne.s32.totalorder %s4327_s13, 0  ;;  %p4338_p11 = scmp.ne.s32.totalorder %s4325_s8, 0 }
  0x96   : > { %p4339_p6 = scmp.eq.s32.totalorder (!%p4338_p11), %s3767_s25, 0 }
  0x97   : > { %3048 = dma.hbm_to_vmem [thread:$0]  (!%p4337_p12), %s3911_s16, 64, %s277_s30, %s3849_s28  }
  0x98   : > { %285 = sbr.rel (%p4338_p11) target bundleno = 1052 (0x41c), region = 44 }
  0x9f   : > { %3665 = dma.done.wait (%p4339_p6), [#allocation5], 256   ;;  %p4340_p10 = pmov %p4339_p6 }
  0xa0   : > { %p4341_p1 = pmov %p4339_p6 }
  0xa1   : > { %3667 = vsyncadd (%p4340_p10), [#allocation5], 4294967040 }
  0xa2   : > { %3669 = dma.done.wait (%p4341_p1), [#allocation8], 256   ;;  %p4342_p0 = pmov %p4341_p1 }
  0xa3   : > { %s295_s13 = sand.u32 1, %s3767_s25   ;;  %s297_s28 = sand.u32 1, %s3686_s22  }
  0xa4   : > { %3671 = vsyncadd (%p4342_p0), [#allocation8], 4294967040  ;;  %s2709_s10 = sshll.u32 %s297_s28, 11  ;;  %s296_s8 = scalar_lea.sflag [#allocation5], %s295_s13 }
  0xa5   : > { %s3964_s16 = scalar_lea.vmem [#allocation9], %s2709_s10  ;;  %p4343_p3 = scmp.ne.s32.totalorder %s4324_s7, 0 }
  0xa7   : > { %3673 = dma.done.wait (%p4343_p3), %s296_s8, 32896  }
  0xa8   : > { %3675 = vsyncadd (%p4343_p3), %s296_s8, 4294934400  ;;  %s3970_s24 = sshll.u32 %s297_s28, 2  ;;  %p4344_p13 = scmp.ne.s32.totalorder %s3767_s25, 0 }
  0xa9   : > { %s308_s3 = scalar_lea.vmem [#allocation10], %s3970_s24  ;;  %s317_s17 = scalar_lea.vmem [#allocation11], %s3970_s24  ;;  %v358_v0 = vld [vmem:[%s4304_s0] sm:$0x3] (!%p4344_p13)  ;;  %v3704_v1 = vmov (!%p4344_p13), 0   ;;  %v3705_v3 = vmov (!%p4344_p13), 0.0   ;;  %v371_v6 = vlaneseq (!%p4344_p13) }
  0xaa   : > { %357 = sbr.rel (%p4344_p13) target bundleno = 327 (0x147), region = 68  ;;  %3102 = vset.pattern.permute.xlu0 (!%p4344_p13), %v3704_v1  ;;  %v363_v2 = vsub.f32 (!%p4344_p13), 1.0, %v358_v0  ;;  %505 = vst [vmem:[#allocation3] sm:$0xff] (!%p4344_p13), %v3705_v3  ;;  %v3706_v4 = vmov (!%p4344_p13), 269488144   ;;  %v359_v14 = vld [vmem:[#allocation4] sm:$0xff] (!%p4344_p13) }
  0xab   : > { %v369_v5 = vunpack.c.l.s4 (!%p4344_p13), %v3706_v4  ;;  %v372_v8 = vshrl.u32 (!%p4344_p13), %v371_v6, 7  ;;  %v3707_v9 = vmov (!%p4344_p13), 1983009808   ;;  %v360_v16 = vld [vmem:[#allocation4 + $0x8] sm:$0xff] (!%p4344_p13)  ;;  %v361_v17 = vld [vmem:[#allocation7] sm:$0xff] (!%p4344_p13)  ;;  %v362_v18 = vld [vmem:[#allocation7 + $0x8] sm:$0xff] (!%p4344_p13) }
  0xac   : > { %366 = vperm.xlu0 (!%p4344_p13), %3102, %v363_v2   ;;  %v398_v10 = vunpack.c.l.s4 (!%p4344_p13), %v3707_v9  ;;  %v3708_v22 = vmov (!%p4344_p13), 1966171168  }
  0xad   : > { %v370_v7 = vunpack.c.0.s8 (!%p4344_p13), %v369_v5  ;;  %v459_v23 = vunpack.c.l.s4 (!%p4344_p13), %v3708_v22 }
  0xae   : > { %v399_v13 = vunpack.c.0.s8 (!%p4344_p13), %v398_v10 }
  0xaf   : > { %v373_v11 = vsub.s32 (!%p4344_p13), %v370_v7, %v372_v8  ;;  %v460_v30 = vunpack.c.0.s8 (!%p4344_p13), %v459_v23 }
  0xb0   : > { %380 = vperm.xlu0 (!%p4344_p13), %3102, %v358_v0   ;;  %v402_v21 = vsub.s32 (!%p4344_p13), %v399_v13, %v372_v8 }
  0xb1   : > { %v463_v39 = vsub.s32 %v460_v30, %v372_v8 }
 0x12b   : > { %v367_v12 = vpop.permute.xlu0 %366 }
 0x12c   : > { %v374_v15 = vrot.slane %v367_v12, %v373_v11 }
 0x12e   : > { %v376_v24 = vmul.f32 %v374_v15, %v359_v14  ;;  %v377_v25 = vmul.f32 %v374_v15, %v360_v16 }
 0x12f   : > { %v381_v19 = vpop.permute.xlu0 %380 }
 0x130   : > { %v388_v20 = vrot.slane %v381_v19, %v373_v11 }
 0x132   : > { %v390_v26 = vmul.f32 %v388_v20, %v361_v17  ;;  %v391_v27 = vmul.f32 %v388_v20, %v362_v18 }
 0x134   : > { %v392_v28 = vadd.f32 %v390_v26, %v376_v24  ;;  %v393_v29 = vadd.f32 %v391_v27, %v377_v25 }
 0x136   : > { %v396_v31 = vcombine.high %v392_v28, %v392_v28  ;;  %v403_v32 = vrot.slane %v392_v28, %v402_v21  ;;  %v413_v33 = vcombine.high %v393_v29, %v393_v29  ;;  %v420_v34 = vrot.slane %v393_v29, %v402_v21 }
 0x138   : > { %v410_v35 = vrot.slane %v396_v31, %v402_v21  ;;  %v411_v36 = vcombine.high %v403_v32, %v403_v32  ;;  %v427_v37 = vrot.slane %v413_v33, %v402_v21  ;;  %v428_v38 = vcombine.high %v420_v34, %v420_v34 }
 0x13a   : > { %v412_v40 = vcombine.high %v410_v35, %v410_v35  ;;  %v429_v41 = vcombine.high %v427_v37, %v427_v37  ;;  %v2713_v42 = vpack.c.bf16 %v411_v36, %v403_v32  ;;  %v2715_v43 = vpack.c.bf16 %v428_v38, %v420_v34 }
 0x13c   : > { %v2714_v44 = vpack.c.bf16 %v412_v40, %v410_v35  ;;  %v2716_v45 = vpack.c.bf16 %v429_v41, %v427_v37  ;;  %v464_v46 = vrot.slane %v2713_v42, %v463_v39  ;;  %v478_v48 = vrot.slane %v2715_v43, %v463_v39 }
 0x13e   : > { %v471_v47 = vrot.slane %v2714_v44, %v463_v39  ;;  %v485_v49 = vrot.slane %v2716_v45, %v463_v39 }
 0x140   : > { %v486_v50 = vcombine.low %v464_v46, %v471_v47  ;;  %v487_v51 = vcombine.low %v478_v48, %v485_v49 }
 0x142   : > { %v494_v52 = vrot.slane %v486_v50, %v463_v39  ;;  %v501_v53 = vrot.slane %v487_v51, %v463_v39 }
 0x144   : > { %v502_v54 = vcombine.low %v494_v52, %v501_v53 }
 0x146   : > { %504 = vst [vmem:[#allocation2] sm:$0xff] %v502_v54 }
 0x147 PF: > { %v3104_v55 = vld [vmem:[%s3964_s16 + $0x4] ss:$16 sps:$4 sm:$0xff]   ;;  %v3106_v56 = vld [vmem:[%s3964_s16 + $0xc] ss:$16 sps:$4 sm:$0xff]   ;;  %v3108_v57 = vld [vmem:[%s3964_s16] ss:$16 sps:$4 sm:$0xff]   ;;  %v772_v27 = vlaneseq }
 0x148   : > { %2159 = vmatprep.subr.bf16.mxu0 %v3104_v55  ;;  %v3109_v58 = vld [vmem:[%s3964_s16 + $0x8] ss:$16 sps:$4 sm:$0xff]   ;;  %2323 = vmatprep.subr.bf16.mxu1 %v3106_v56  ;;  %v3110_v59 = vld [vmem:[%s3964_s16 + $0x24] ss:$16 sps:$4 sm:$0xff]   ;;  %v3112_v60 = vld [vmem:[%s3964_s16 + $0x2c] ss:$16 sps:$4 sm:$0xff]  }
 0x149   : > { %2160 = vmatpush1.bf16.msra.mxu0 %v3108_v57  ;;  %2324 = vmatpush1.bf16.msra.mxu1 %v3109_v58  ;;  %v3114_v61 = vld [vmem:[%s3964_s16 + $0x20] ss:$16 sps:$4 sm:$0xff]   ;;  %v3115_v62 = vld [vmem:[%s3964_s16 + $0x28] ss:$16 sps:$4 sm:$0xff]   ;;  %v3116_v63 = vld [vmem:[%s3964_s16 + $0x44] ss:$16 sps:$4 sm:$0xff]  }
 0x14a   : > { %2161 = vmatprep.subr.bf16.mxu0 %v3110_v59  ;;  %2325 = vmatprep.subr.bf16.mxu1 %v3112_v60  ;;  %v3118_v0 = vld [vmem:[%s3964_s16 + $0x4c] ss:$16 sps:$4 sm:$0xff]   ;;  %v3120_v1 = vld [vmem:[%s3964_s16 + $0x40] ss:$16 sps:$4 sm:$0xff]   ;;  %v3121_v2 = vld [vmem:[%s3964_s16 + $0x48] ss:$16 sps:$4 sm:$0xff]  }
 0x14b   : > { %v3122_v3 = vld [vmem:[%s3964_s16 + $0x64] ss:$16 sps:$4 sm:$0xff]   ;;  %v3124_v4 = vld [vmem:[%s3964_s16 + $0x6c] ss:$16 sps:$4 sm:$0xff]   ;;  %v3126_v5 = vld [vmem:[%s3964_s16 + $0x60] ss:$16 sps:$4 sm:$0xff]  }
 0x14c   : > { %v3127_v6 = vld [vmem:[%s3964_s16 + $0x68] ss:$16 sps:$4 sm:$0xff]   ;;  %v3128_v7 = vld [vmem:[%s3964_s16 + $0x84] ss:$16 sps:$4 sm:$0xff]   ;;  %v3130_v8 = vld [vmem:[%s3964_s16 + $0x8c] ss:$16 sps:$4 sm:$0xff]  }
 0x14d   : > { %2162 = vmatpush1.bf16.msra.mxu0 %v3114_v61  ;;  %2326 = vmatpush1.bf16.msra.mxu1 %v3115_v62  ;;  %v3132_v9 = vld [vmem:[%s3964_s16 + $0x80] ss:$16 sps:$4 sm:$0xff]   ;;  %v3133_v10 = vld [vmem:[%s3964_s16 + $0x88] ss:$16 sps:$4 sm:$0xff]   ;;  %v3134_v11 = vld [vmem:[%s3964_s16 + $0xa4] ss:$16 sps:$4 sm:$0xff]  }
 0x14e   : > { %2163 = vmatprep.subr.bf16.mxu0 %v3116_v63  ;;  %2327 = vmatprep.subr.bf16.mxu1 %v3118_v0  ;;  %v3136_v12 = vld [vmem:[%s3964_s16 + $0xac] ss:$16 sps:$4 sm:$0xff]   ;;  %v3138_v13 = vld [vmem:[%s3964_s16 + $0xa0] ss:$16 sps:$4 sm:$0xff]   ;;  %v3139_v14 = vld [vmem:[%s3964_s16 + $0xa8] ss:$16 sps:$4 sm:$0xff]  }
 0x14f   : > { %v3140_v15 = vld [vmem:[%s3964_s16 + $0xc4] ss:$16 sps:$4 sm:$0xff]   ;;  %v3142_v16 = vld [vmem:[%s3964_s16 + $0xcc] ss:$16 sps:$4 sm:$0xff]   ;;  %v3144_v17 = vld [vmem:[%s3964_s16 + $0xc0] ss:$16 sps:$4 sm:$0xff]  }
 0x150   : > { %v3145_v18 = vld [vmem:[%s3964_s16 + $0xc8] ss:$16 sps:$4 sm:$0xff]   ;;  %v3146_v19 = vld [vmem:[%s3964_s16 + $0xe4] ss:$16 sps:$4 sm:$0xff]   ;;  %v3148_v20 = vld [vmem:[%s3964_s16 + $0xec] ss:$16 sps:$4 sm:$0xff]  }
 0x151   : > { %2164 = vmatpush1.bf16.msra.mxu0 %v3120_v1  ;;  %2328 = vmatpush1.bf16.msra.mxu1 %v3121_v2  ;;  %v3150_v21 = vld [vmem:[%s3964_s16 + $0xe0] ss:$16 sps:$4 sm:$0xff]   ;;  %v3151_v22 = vld [vmem:[%s3964_s16 + $0xe8] ss:$16 sps:$4 sm:$0xff]   ;;  %v3152_v23 = vld [vmem:[%s3964_s16 + $0x104] ss:$16 sps:$4 sm:$0xff]  }
 0x152   : > { %2165 = vmatprep.subr.bf16.mxu0 %v3122_v3  ;;  %2329 = vmatprep.subr.bf16.mxu1 %v3124_v4  ;;  %v3154_v24 = vld [vmem:[%s3964_s16 + $0x10c] ss:$16 sps:$4 sm:$0xff]   ;;  %v3156_v25 = vld [vmem:[%s3964_s16 + $0x100] ss:$16 sps:$4 sm:$0xff]   ;;  %v3157_v26 = vld [vmem:[%s3964_s16 + $0x108] ss:$16 sps:$4 sm:$0xff]  }
 0x153   : > { %v3709_v28 = vmov 1966171168   ;;  %v3158_v30 = vld [vmem:[%s3964_s16 + $0x124] ss:$16 sps:$4 sm:$0xff]   ;;  %v3160_v31 = vld [vmem:[%s3964_s16 + $0x12c] ss:$16 sps:$4 sm:$0xff]  }
 0x154   : > { %v824_v29 = vunpack.c.l.s4 %v3709_v28  ;;  %v3162_v32 = vld [vmem:[%s3964_s16 + $0x120] ss:$16 sps:$4 sm:$0xff]   ;;  %v4018_v33 = vshrl.u32 %v772_v27, 7  ;;  %v3163_v35 = vld [vmem:[%s3964_s16 + $0x128] ss:$16 sps:$4 sm:$0xff]   ;;  %s2973_s14 = sshll.u32 %s3767_s25, 9 }
 0x155   : > { %2166 = vmatpush1.bf16.msra.mxu0 %v3126_v5  ;;  %2330 = vmatpush1.bf16.msra.mxu1 %v3127_v6  ;;  %v3164_v36 = vld [vmem:[%s3964_s16 + $0x144] ss:$16 sps:$4 sm:$0xff]   ;;  %v3166_v37 = vld [vmem:[%s3964_s16 + $0x14c] ss:$16 sps:$4 sm:$0xff]   ;;  %v3168_v38 = vld [vmem:[%s3964_s16 + $0x140] ss:$16 sps:$4 sm:$0xff]  }
 0x156   : > { %2167 = vmatprep.subr.bf16.mxu0 %v3128_v7  ;;  %2331 = vmatprep.subr.bf16.mxu1 %v3130_v8  ;;  %v825_v34 = vunpack.c.0.s8 %v824_v29  ;;  %v3169_v39 = vld [vmem:[%s3964_s16 + $0x148] ss:$16 sps:$4 sm:$0xff]   ;;  %v3170_v41 = vld [vmem:[%s3964_s16 + $0x164] ss:$16 sps:$4 sm:$0xff]   ;;  %v3172_v42 = vld [vmem:[%s3964_s16 + $0x16c] ss:$16 sps:$4 sm:$0xff]  }
 0x157   : > { %v506_v43 = vld [vmem:[#allocation2] sm:$0xff]  ;;  %v3175_v46 = vld [vmem:[%s3964_s16 + $0x168] ss:$16 sps:$4 sm:$0xff]   ;;  %v3178_v48 = vld [vmem:[%s3964_s16 + $0x18c] ss:$16 sps:$4 sm:$0xff]   ;;  %s2488_s12 = sshra.s32 %s2973_s14, 7 }
 0x158   : > { %v4026_v40 = vsub.s32 %v825_v34, %v4018_v33  ;;  %v3174_v44 = vld [vmem:[%s3964_s16 + $0x160] ss:$16 sps:$4 sm:$0xff]   ;;  %v3176_v47 = vld [vmem:[%s3964_s16 + $0x184] ss:$16 sps:$4 sm:$0xff]   ;;  %v3181_v52 = vld [vmem:[%s3964_s16 + $0x188] ss:$16 sps:$4 sm:$0xff]   ;;  %v822_v0 = vcombine.high %v506_v43, %v506_v43 }
 0x159   : > { %2168 = vmatpush1.bf16.msra.mxu0 %v3132_v9  ;;  %2332 = vmatpush1.bf16.msra.mxu1 %v3133_v10  ;;  %v3180_v50 = vld [vmem:[%s3964_s16 + $0x180] ss:$16 sps:$4 sm:$0xff]   ;;  %v3182_v53 = vld [vmem:[%s3964_s16 + $0x1a4] ss:$16 sps:$4 sm:$0xff]   ;;  %v3184_v54 = vld [vmem:[%s3964_s16 + $0x1ac] ss:$16 sps:$4 sm:$0xff]  }
 0x15a   : > { %2169 = vmatprep.subr.bf16.mxu0 %v3134_v11  ;;  %2333 = vmatprep.subr.bf16.mxu1 %v3136_v12  ;;  %v829_v45 = vrot.slane %v506_v43, %v4026_v40  ;;  %v3186_v55 = vld [vmem:[%s3964_s16 + $0x1a0] ss:$16 sps:$4 sm:$0xff]   ;;  %v3187_v56 = vld [vmem:[%s3964_s16 + $0x1a8] ss:$16 sps:$4 sm:$0xff]   ;;  %v3188_v57 = vld [vmem:[%s3964_s16 + $0x1c4] ss:$16 sps:$4 sm:$0xff]   ;;  %v836_v4 = vrot.slane %v822_v0, %v4026_v40 }
 0x15b   : > { %v3190_v58 = vld [vmem:[%s3964_s16 + $0x1cc] ss:$16 sps:$4 sm:$0xff]   ;;  %v3192_v59 = vld [vmem:[%s3964_s16 + $0x1c0] ss:$16 sps:$4 sm:$0xff]   ;;  %v3193_v60 = vld [vmem:[%s3964_s16 + $0x1c8] ss:$16 sps:$4 sm:$0xff]  }
 0x15c   : > { %v837_v49 = vcombine.high %v829_v45, %v829_v45  ;;  %v3194_v61 = vld [vmem:[%s3964_s16 + $0x1e4] ss:$16 sps:$4 sm:$0xff]   ;;  %v3196_v62 = vld [vmem:[%s3964_s16 + $0x1ec] ss:$16 sps:$4 sm:$0xff]   ;;  %v3198_v63 = vld [vmem:[%s3964_s16 + $0x1e0] ss:$16 sps:$4 sm:$0xff]   ;;  %v4055_v6 = vrot.slane %v829_v45, %v4026_v40  ;;  %v838_v7 = vcombine.high %v836_v4, %v836_v4  ;;  %v4064_v12 = vrot.slane %v836_v4, %v4026_v40 }
 0x15d   : > { %2170 = vmatpush1.bf16.msra.mxu0 %v3138_v13  ;;  %2334 = vmatpush1.bf16.msra.mxu1 %v3139_v14  ;;  %v3199_v1 = vld [vmem:[%s3964_s16 + $0x1e8] ss:$16 sps:$4 sm:$0xff]   ;;  %v3202_v2 = vld [vmem:[%s3964_s16 + $0x204] ss:$16 sps:$4 sm:$0xff]   ;;  %v3205_v3 = vld [vmem:[%s3964_s16 + $0x20c] ss:$16 sps:$4 sm:$0xff]  }
 0x15e   : > { %2171 = vmatprep.subr.bf16.mxu0 %v3140_v15  ;;  %2335 = vmatprep.subr.bf16.mxu1 %v3142_v16  ;;  %v859_v51 = vrot.slane %v837_v49, %v4026_v40  ;;  %v3200_v5 = vld [vmem:[%s3964_s16 + $0x200] ss:$16 sps:$4 sm:$0xff]   ;;  %v3203_v8 = vld [vmem:[%s3964_s16 + $0x208] ss:$16 sps:$4 sm:$0xff]   ;;  %v3208_v9 = vld [vmem:[%s3964_s16 + $0x224] ss:$16 sps:$4 sm:$0xff]   ;;  %v4061_v11 = vrot.slane %v838_v7, %v4026_v40 }
 0x15f   : > { %v3211_v10 = vld [vmem:[%s3964_s16 + $0x22c] ss:$16 sps:$4 sm:$0xff]   ;;  %v3206_v14 = vld [vmem:[%s3964_s16 + $0x220] ss:$16 sps:$4 sm:$0xff]   ;;  %v3209_v15 = vld [vmem:[%s3964_s16 + $0x228] ss:$16 sps:$4 sm:$0xff]  }
 0x160   : > { %2191 = vmatprep.mubr.bf16.mxu0 %v859_v51  ;;  %2355 = vmatprep.mubr.bf16.mxu1 %v859_v51  ;;  %v869_v13 = vcombine.high %v859_v51, %v859_v51  ;;  %v3214_v16 = vld [vmem:[%s3964_s16 + $0x244] ss:$16 sps:$4 sm:$0xff]   ;;  %v3227_v27 = vld [vmem:[%s3964_s16 + $0x288] ss:$16 sps:$4 sm:$0xff]   ;;  %v3235_v29 = vld [vmem:[%s3964_s16 + $0x2ac] ss:$16 sps:$4 sm:$0xff]  }
 0x161   : > { %2172 = vmatpush1.bf16.msra.mxu0 %v3144_v17  ;;  %2336 = vmatpush1.bf16.msra.mxu1 %v3145_v18  ;;  %v3217_v17 = vld [vmem:[%s3964_s16 + $0x24c] ss:$16 sps:$4 sm:$0xff]   ;;  %v3212_v18 = vld [vmem:[%s3964_s16 + $0x240] ss:$16 sps:$4 sm:$0xff]   ;;  %v3232_v28 = vld [vmem:[%s3964_s16 + $0x2a4] ss:$16 sps:$4 sm:$0xff]  }
 0x162   : > { %2173 = vmatprep.subr.bf16.mxu0 %v3146_v19  ;;  %2337 = vmatprep.subr.bf16.mxu1 %v3148_v20  ;;  %v3215_v19 = vld [vmem:[%s3964_s16 + $0x248] ss:$16 sps:$4 sm:$0xff]   ;;  %v3220_v20 = vld [vmem:[%s3964_s16 + $0x264] ss:$16 sps:$4 sm:$0xff]   ;;  %v3241_v34 = vld [vmem:[%s3964_s16 + $0x2cc] ss:$16 sps:$4 sm:$0xff]  }
 0x163   : > { %v3245_v40 = vld [vmem:[%s3964_s16 + $0x2e8] ss:$16 sps:$4 sm:$0xff]   ;;  %v3248_v43 = vld [vmem:[%s3964_s16 + $0x300] ss:$16 sps:$4 sm:$0xff]   ;;  %v3256_v45 = vld [vmem:[%s3964_s16 + $0x324] ss:$16 sps:$4 sm:$0xff]  }
 0x164   : > { %v3262_v49 = vld [vmem:[%s3964_s16 + $0x344] ss:$16 sps:$4 sm:$0xff]   ;;  %v3260_v51 = vld [vmem:[%s3964_s16 + $0x340] ss:$16 sps:$4 sm:$0xff]   ;;  %v3281_v0 = vld [vmem:[%s3964_s16 + $0x3a8] ss:$16 sps:$4 sm:$0xff]  }
 0x165   : > { %2174 = vmatpush1.bf16.msra.mxu0 %v3150_v21  ;;  %2338 = vmatpush1.bf16.msra.mxu1 %v3151_v22  ;;  %v3223_v21 = vld [vmem:[%s3964_s16 + $0x26c] ss:$16 sps:$4 sm:$0xff]   ;;  %v3218_v22 = vld [vmem:[%s3964_s16 + $0x260] ss:$16 sps:$4 sm:$0xff]   ;;  %v3287_v4 = vld [vmem:[%s3964_s16 + $0x3c8] ss:$16 sps:$4 sm:$0xff]  }
 0x166   : > { %2175 = vmatprep.subr.bf16.mxu0 %v3152_v23  ;;  %2339 = vmatprep.subr.bf16.mxu1 %v3154_v24  ;;  %v3221_v23 = vld [vmem:[%s3964_s16 + $0x268] ss:$16 sps:$4 sm:$0xff]   ;;  %v3226_v24 = vld [vmem:[%s3964_s16 + $0x284] ss:$16 sps:$4 sm:$0xff]   ;;  %v3295_v7 = vld [vmem:[%s3964_s16 + $0x3ec] ss:$16 sps:$4 sm:$0xff]  }
 0x167   : > { %s2974_s11 = sshll.u32 %s2488_s12, 1  ;;  %p2976_p2 = scmp.ne.s32.totalorder %s3767_s25, 1 }
 0x168   : > { %s2491_s20 = scalar_lea.vmem [#allocation7], %s2974_s11  ;;  %s2494_s18 = scalar_lea.vmem [#allocation4], %s2974_s11  ;;  %vm2551_vm0 = vcmask (!%p2976_p2), 1041408  }
 0x169   : > { %2176 = vmatpush1.bf16.msra.mxu0 %v3156_v25  ;;  %2340 = vmatpush1.bf16.msra.mxu1 %v3157_v26  ;;  %v3229_v25 = vld [vmem:[%s3964_s16 + $0x28c] ss:$16 sps:$4 sm:$0xff]   ;;  %v3224_v26 = vld [vmem:[%s3964_s16 + $0x280] ss:$16 sps:$4 sm:$0xff]  }
 0x16a   : > { %2177 = vmatprep.subr.bf16.mxu0 %v3158_v30  ;;  %2341 = vmatprep.subr.bf16.mxu1 %v3160_v31  ;;  %v3230_v30 = vld [vmem:[%s3964_s16 + $0x2a0] ss:$16 sps:$4 sm:$0xff]   ;;  %v3233_v31 = vld [vmem:[%s3964_s16 + $0x2a8] ss:$16 sps:$4 sm:$0xff]  }
 0x16d   : > { %2178 = vmatpush1.bf16.msra.mxu0 %v3162_v32  ;;  %2342 = vmatpush1.bf16.msra.mxu1 %v3163_v35  ;;  %v3238_v32 = vld [vmem:[%s3964_s16 + $0x2c4] ss:$16 sps:$4 sm:$0xff]   ;;  %v3236_v35 = vld [vmem:[%s3964_s16 + $0x2c0] ss:$16 sps:$4 sm:$0xff]  }
 0x16e   : > { %2179 = vmatprep.subr.bf16.mxu0 %v3164_v36  ;;  %2343 = vmatprep.subr.bf16.mxu1 %v3166_v37  ;;  %v3239_v36 = vld [vmem:[%s3964_s16 + $0x2c8] ss:$16 sps:$4 sm:$0xff]   ;;  %v3244_v37 = vld [vmem:[%s3964_s16 + $0x2e4] ss:$16 sps:$4 sm:$0xff]  }
 0x171   : > { %2180 = vmatpush1.bf16.msra.mxu0 %v3168_v38  ;;  %2344 = vmatpush1.bf16.msra.mxu1 %v3169_v39  ;;  %v3247_v38 = vld [vmem:[%s3964_s16 + $0x2ec] ss:$16 sps:$4 sm:$0xff]   ;;  %v3242_v39 = vld [vmem:[%s3964_s16 + $0x2e0] ss:$16 sps:$4 sm:$0xff]  }
 0x172   : > { %2181 = vmatprep.subr.bf16.mxu0 %v3170_v41  ;;  %2345 = vmatprep.subr.bf16.mxu1 %v3172_v42  ;;  %v3250_v41 = vld [vmem:[%s3964_s16 + $0x304] ss:$16 sps:$4 sm:$0xff]   ;;  %v3253_v42 = vld [vmem:[%s3964_s16 + $0x30c] ss:$16 sps:$4 sm:$0xff]  }
 0x175   : > { %2182 = vmatpush1.bf16.msra.mxu0 %v3174_v44  ;;  %2346 = vmatpush1.bf16.msra.mxu1 %v3175_v46  ;;  %v3251_v44 = vld [vmem:[%s3964_s16 + $0x308] ss:$16 sps:$4 sm:$0xff]   ;;  %v3259_v46 = vld [vmem:[%s3964_s16 + $0x32c] ss:$16 sps:$4 sm:$0xff]  }
 0x176   : > { %2183 = vmatprep.subr.bf16.mxu0 %v3176_v47  ;;  %2347 = vmatprep.subr.bf16.mxu1 %v3178_v48  ;;  %v3254_v47 = vld [vmem:[%s3964_s16 + $0x320] ss:$16 sps:$4 sm:$0xff]   ;;  %v3257_v48 = vld [vmem:[%s3964_s16 + $0x328] ss:$16 sps:$4 sm:$0xff]  }
 0x179   : > { %2184 = vmatpush1.bf16.msra.mxu0 %v3180_v50  ;;  %2348 = vmatpush1.bf16.msra.mxu1 %v3181_v52  ;;  %v3265_v50 = vld [vmem:[%s3964_s16 + $0x34c] ss:$16 sps:$4 sm:$0xff]   ;;  %v3263_v52 = vld [vmem:[%s3964_s16 + $0x348] ss:$16 sps:$4 sm:$0xff]  }
 0x17a   : > { %2185 = vmatprep.subr.bf16.mxu0 %v3182_v53  ;;  %2349 = vmatprep.subr.bf16.mxu1 %v3184_v54  ;;  %v3268_v53 = vld [vmem:[%s3964_s16 + $0x364] ss:$16 sps:$4 sm:$0xff]   ;;  %v3271_v54 = vld [vmem:[%s3964_s16 + $0x36c] ss:$16 sps:$4 sm:$0xff]  }
 0x17d   : > { %2186 = vmatpush1.bf16.msra.mxu0 %v3186_v55  ;;  %2350 = vmatpush1.bf16.msra.mxu1 %v3187_v56  ;;  %v3266_v55 = vld [vmem:[%s3964_s16 + $0x360] ss:$16 sps:$4 sm:$0xff]   ;;  %v3269_v56 = vld [vmem:[%s3964_s16 + $0x368] ss:$16 sps:$4 sm:$0xff]  }
 0x17e   : > { %2187 = vmatprep.subr.bf16.mxu0 %v3188_v57  ;;  %2351 = vmatprep.subr.bf16.mxu1 %v3190_v58  ;;  %v3274_v57 = vld [vmem:[%s3964_s16 + $0x384] ss:$16 sps:$4 sm:$0xff]   ;;  %v3277_v58 = vld [vmem:[%s3964_s16 + $0x38c] ss:$16 sps:$4 sm:$0xff]  }
 0x181   : > { %2188 = vmatpush1.bf16.msra.mxu0 %v3192_v59  ;;  %2352 = vmatpush1.bf16.msra.mxu1 %v3193_v60  ;;  %v3272_v59 = vld [vmem:[%s3964_s16 + $0x380] ss:$16 sps:$4 sm:$0xff]   ;;  %v3275_v60 = vld [vmem:[%s3964_s16 + $0x388] ss:$16 sps:$4 sm:$0xff]  }
 0x182   : > { %2189 = vmatprep.subr.bf16.mxu0 %v3194_v61  ;;  %2353 = vmatprep.subr.bf16.mxu1 %v3196_v62  ;;  %v3280_v61 = vld [vmem:[%s3964_s16 + $0x3a4] ss:$16 sps:$4 sm:$0xff]   ;;  %v3283_v62 = vld [vmem:[%s3964_s16 + $0x3ac] ss:$16 sps:$4 sm:$0xff]  }
 0x185   : > { %2190 = vmatpush1.bf16.msra.mxu0 %v3198_v63  ;;  %2354 = vmatpush1.bf16.msra.mxu1 %v3199_v1  ;;  %v3278_v63 = vld [vmem:[%s3964_s16 + $0x3a0] ss:$16 sps:$4 sm:$0xff]   ;;  %v3286_v1 = vld [vmem:[%s3964_s16 + $0x3c4] ss:$16 sps:$4 sm:$0xff]  }
 0x186   : > { %2200 = vmatprep.subr.bf16.mxu0 %v3202_v2  ;;  %2364 = vmatprep.subr.bf16.mxu1 %v3205_v3  ;;  %v3289_v2 = vld [vmem:[%s3964_s16 + $0x3cc] ss:$16 sps:$4 sm:$0xff]   ;;  %v3284_v3 = vld [vmem:[%s3964_s16 + $0x3c0] ss:$16 sps:$4 sm:$0xff]  }
 0x188   : > { %2192 = vmatmul.mubr.bf16.vlgmr.msra.gmra.mrb[0].mxu0 %v4055_v6  ;;  %2356 = vmatmul.mubr.bf16.vlgmr.msra.gmra.mrb[0].mxu1 %v4055_v6 }
 0x189   : > { %2201 = vmatpush1.bf16.msra.mxu0 %v3200_v5  ;;  %2365 = vmatpush1.bf16.msra.mxu1 %v3203_v8  ;;  %v3292_v5 = vld [vmem:[%s3964_s16 + $0x3e4] ss:$16 sps:$4 sm:$0xff]   ;;  %v3290_v8 = vld [vmem:[%s3964_s16 + $0x3e0] ss:$16 sps:$4 sm:$0xff]  }
 0x18a   : > { %2202 = vmatprep.subr.bf16.mxu0 %v3208_v9  ;;  %2366 = vmatprep.subr.bf16.mxu1 %v3211_v10  ;;  %v3293_v9 = vld [vmem:[%s3964_s16 + $0x3e8] ss:$16 sps:$4 sm:$0xff]   ;;  %v3298_v10 = vld [vmem:[%s3964_s16 + $0x404] ss:$16 sps:$4 sm:$0xff]  }
 0x18b   : > { %2232 = vmatprep.mubr.bf16.mxu0 %v869_v13  ;;  %2396 = vmatprep.mubr.bf16.mxu1 %v869_v13  ;;  %v3301_v13 = vld [vmem:[%s3964_s16 + $0x40c] ss:$16 sps:$4 sm:$0xff]  }
 0x18d   : > { %2203 = vmatpush1.bf16.msra.mxu0 %v3206_v14  ;;  %2367 = vmatpush1.bf16.msra.mxu1 %v3209_v15  ;;  %v3296_v14 = vld [vmem:[%s3964_s16 + $0x400] ss:$16 sps:$4 sm:$0xff]   ;;  %v867_v15 = vcombine.high %v4055_v6, %v4055_v6  ;;  %v3310_v6 = vld [vmem:[%s3964_s16 + $0x444] ss:$16 sps:$4 sm:$0xff]  }
 0x18e   : > { %2204 = vmatprep.subr.bf16.mxu0 %v3214_v16  ;;  %2368 = vmatprep.subr.bf16.mxu1 %v3217_v17  ;;  %v3299_v16 = vld [vmem:[%s3964_s16 + $0x408] ss:$16 sps:$4 sm:$0xff]   ;;  %v3304_v17 = vld [vmem:[%s3964_s16 + $0x424] ss:$16 sps:$4 sm:$0xff]  }
 0x191   : > { %2205 = vmatpush1.bf16.msra.mxu0 %v3212_v18  ;;  %2369 = vmatpush1.bf16.msra.mxu1 %v3215_v19  ;;  %v3307_v18 = vld [vmem:[%s3964_s16 + $0x42c] ss:$16 sps:$4 sm:$0xff]   ;;  %v3302_v19 = vld [vmem:[%s3964_s16 + $0x420] ss:$16 sps:$4 sm:$0xff]  }
 0x192   : > { %2206 = vmatprep.subr.bf16.mxu0 %v3220_v20  ;;  %2370 = vmatprep.subr.bf16.mxu1 %v3223_v21  ;;  %v3305_v20 = vld [vmem:[%s3964_s16 + $0x428] ss:$16 sps:$4 sm:$0xff]   ;;  %v3313_v21 = vld [vmem:[%s3964_s16 + $0x44c] ss:$16 sps:$4 sm:$0xff]  }
 0x195   : > { %2207 = vmatpush1.bf16.msra.mxu0 %v3218_v22  ;;  %2371 = vmatpush1.bf16.msra.mxu1 %v3221_v23  ;;  %v3308_v22 = vld [vmem:[%s3964_s16 + $0x440] ss:$16 sps:$4 sm:$0xff]   ;;  %v3710_v23 = vmov 0  }
 0x196   : > { %2208 = vmatprep.subr.bf16.mxu0 %v3226_v24  ;;  %2372 = vmatprep.subr.bf16.mxu1 %v3229_v25  ;;  %v3311_v24 = vld [vmem:[%s3964_s16 + $0x448] ss:$16 sps:$4 sm:$0xff]   ;;  %v3316_v25 = vld [vmem:[%s3964_s16 + $0x464] ss:$16 sps:$4 sm:$0xff]  }
 0x197   : > { %3103 = vset.pattern.permute.xlu0 %v3710_v23  ;;  %v870_v23 = vcombine.high %v4061_v11, %v4061_v11 }
 0x199   : > { %2209 = vmatpush1.bf16.msra.mxu0 %v3224_v26  ;;  %2373 = vmatpush1.bf16.msra.mxu1 %v3227_v27  ;;  %v3319_v26 = vld [vmem:[%s3964_s16 + $0x46c] ss:$16 sps:$4 sm:$0xff]   ;;  %v3314_v27 = vld [vmem:[%s3964_s16 + $0x460] ss:$16 sps:$4 sm:$0xff]  }
 0x19a   : > { %2210 = vmatprep.subr.bf16.mxu0 %v3232_v28  ;;  %2374 = vmatprep.subr.bf16.mxu1 %v3235_v29  ;;  %v3317_v28 = vld [vmem:[%s3964_s16 + $0x468] ss:$16 sps:$4 sm:$0xff]   ;;  %v3322_v29 = vld [vmem:[%s3964_s16 + $0x484] ss:$16 sps:$4 sm:$0xff]  }
 0x19d   : > { %2211 = vmatpush1.bf16.msra.mxu0 %v3230_v30  ;;  %2375 = vmatpush1.bf16.msra.mxu1 %v3233_v31  ;;  %v3325_v30 = vld [vmem:[%s3964_s16 + $0x48c] ss:$16 sps:$4 sm:$0xff]   ;;  %v3320_v31 = vld [vmem:[%s3964_s16 + $0x480] ss:$16 sps:$4 sm:$0xff]  }
 0x19e   : > { %2212 = vmatprep.subr.bf16.mxu0 %v3238_v32  ;;  %2376 = vmatprep.subr.bf16.mxu1 %v3241_v34  ;;  %v3323_v32 = vld [vmem:[%s3964_s16 + $0x488] ss:$16 sps:$4 sm:$0xff]   ;;  %v3328_v34 = vld [vmem:[%s3964_s16 + $0x4a4] ss:$16 sps:$4 sm:$0xff]  }
 0x1a1   : > { %2213 = vmatpush1.bf16.msra.mxu0 %v3236_v35  ;;  %2377 = vmatpush1.bf16.msra.mxu1 %v3239_v36  ;;  %v3331_v35 = vld [vmem:[%s3964_s16 + $0x4ac] ss:$16 sps:$4 sm:$0xff]   ;;  %v3326_v36 = vld [vmem:[%s3964_s16 + $0x4a0] ss:$16 sps:$4 sm:$0xff]  }
 0x1a2   : > { %2214 = vmatprep.subr.bf16.mxu0 %v3244_v37  ;;  %2378 = vmatprep.subr.bf16.mxu1 %v3247_v38  ;;  %v3329_v37 = vld [vmem:[%s3964_s16 + $0x4a8] ss:$16 sps:$4 sm:$0xff]   ;;  %v3334_v38 = vld [vmem:[%s3964_s16 + $0x4c4] ss:$16 sps:$4 sm:$0xff]  }
 0x1a5   : > { %2215 = vmatpush1.bf16.msra.mxu0 %v3242_v39  ;;  %2379 = vmatpush1.bf16.msra.mxu1 %v3245_v40  ;;  %v3337_v39 = vld [vmem:[%s3964_s16 + $0x4cc] ss:$16 sps:$4 sm:$0xff]   ;;  %v3332_v40 = vld [vmem:[%s3964_s16 + $0x4c0] ss:$16 sps:$4 sm:$0xff]  }
 0x1a6   : > { %2216 = vmatprep.subr.bf16.mxu0 %v3250_v41  ;;  %2380 = vmatprep.subr.bf16.mxu1 %v3253_v42  ;;  %v3335_v41 = vld [vmem:[%s3964_s16 + $0x4c8] ss:$16 sps:$4 sm:$0xff]   ;;  %v3340_v42 = vld [vmem:[%s3964_s16 + $0x4e4] ss:$16 sps:$4 sm:$0xff]  }
 0x1a9   : > { %2217 = vmatpush1.bf16.msra.mxu0 %v3248_v43  ;;  %2381 = vmatpush1.bf16.msra.mxu1 %v3251_v44  ;;  %v3343_v43 = vld [vmem:[%s3964_s16 + $0x4ec] ss:$16 sps:$4 sm:$0xff]   ;;  %v3338_v44 = vld [vmem:[%s3964_s16 + $0x4e0] ss:$16 sps:$4 sm:$0xff]  }
 0x1aa   : > { %2218 = vmatprep.subr.bf16.mxu0 %v3256_v45  ;;  %2382 = vmatprep.subr.bf16.mxu1 %v3259_v46  ;;  %v3341_v45 = vld [vmem:[%s3964_s16 + $0x4e8] ss:$16 sps:$4 sm:$0xff]   ;;  %v3346_v46 = vld [vmem:[%s3964_s16 + $0x504] ss:$16 sps:$4 sm:$0xff]  }
 0x1ad   : > { %2219 = vmatpush1.bf16.msra.mxu0 %v3254_v47  ;;  %2383 = vmatpush1.bf16.msra.mxu1 %v3257_v48  ;;  %v3349_v47 = vld [vmem:[%s3964_s16 + $0x50c] ss:$16 sps:$4 sm:$0xff]   ;;  %v3344_v48 = vld [vmem:[%s3964_s16 + $0x500] ss:$16 sps:$4 sm:$0xff]  }
 0x1ae   : > { %2220 = vmatprep.subr.bf16.mxu0 %v3262_v49  ;;  %2384 = vmatprep.subr.bf16.mxu1 %v3265_v50  ;;  %v3347_v49 = vld [vmem:[%s3964_s16 + $0x508] ss:$16 sps:$4 sm:$0xff]   ;;  %v3352_v50 = vld [vmem:[%s3964_s16 + $0x524] ss:$16 sps:$4 sm:$0xff]  }
 0x1b1   : > { %2221 = vmatpush1.bf16.msra.mxu0 %v3260_v51  ;;  %2385 = vmatpush1.bf16.msra.mxu1 %v3263_v52  ;;  %v3355_v51 = vld [vmem:[%s3964_s16 + $0x52c] ss:$16 sps:$4 sm:$0xff]   ;;  %v3350_v52 = vld [vmem:[%s3964_s16 + $0x520] ss:$16 sps:$4 sm:$0xff]  }
 0x1b2   : > { %2222 = vmatprep.subr.bf16.mxu0 %v3268_v53  ;;  %2386 = vmatprep.subr.bf16.mxu1 %v3271_v54  ;;  %v3353_v53 = vld [vmem:[%s3964_s16 + $0x528] ss:$16 sps:$4 sm:$0xff]   ;;  %v3358_v54 = vld [vmem:[%s3964_s16 + $0x544] ss:$16 sps:$4 sm:$0xff]  }
 0x1b5   : > { %2223 = vmatpush1.bf16.msra.mxu0 %v3266_v55  ;;  %2387 = vmatpush1.bf16.msra.mxu1 %v3269_v56  ;;  %v3361_v55 = vld [vmem:[%s3964_s16 + $0x54c] ss:$16 sps:$4 sm:$0xff]   ;;  %v3356_v56 = vld [vmem:[%s3964_s16 + $0x540] ss:$16 sps:$4 sm:$0xff]  }
 0x1b6   : > { %2224 = vmatprep.subr.bf16.mxu0 %v3274_v57  ;;  %2388 = vmatprep.subr.bf16.mxu1 %v3277_v58  ;;  %v3359_v57 = vld [vmem:[%s3964_s16 + $0x548] ss:$16 sps:$4 sm:$0xff]   ;;  %v3364_v58 = vld [vmem:[%s3964_s16 + $0x564] ss:$16 sps:$4 sm:$0xff]  }
 0x1b9   : > { %2225 = vmatpush1.bf16.msra.mxu0 %v3272_v59  ;;  %2389 = vmatpush1.bf16.msra.mxu1 %v3275_v60  ;;  %v3367_v59 = vld [vmem:[%s3964_s16 + $0x56c] ss:$16 sps:$4 sm:$0xff]   ;;  %v764_v60 = vld [vmem:[%s4304_s0] sm:$0x3] }
 0x1ba   : > { %2226 = vmatprep.subr.bf16.mxu0 %v3280_v61  ;;  %2390 = vmatprep.subr.bf16.mxu1 %v3283_v62  ;;  %v3362_v61 = vld [vmem:[%s3964_s16 + $0x560] ss:$16 sps:$4 sm:$0xff]   ;;  %v3365_v62 = vld [vmem:[%s3964_s16 + $0x568] ss:$16 sps:$4 sm:$0xff]  }
 0x1bb   : > { %768 = vperm.xlu0 %3103, %v764_v60   ;;  %v3453_v60 = vld [vmem:[%s3964_s16 + $0x740] ss:$16 sps:$4 sm:$0xff]  }
 0x1bd   : > { %2227 = vmatpush1.bf16.msra.mxu0 %v3278_v63  ;;  %2391 = vmatpush1.bf16.msra.mxu1 %v3281_v0  ;;  %v3370_v63 = vld [vmem:[%s3964_s16 + $0x584] ss:$16 sps:$4 sm:$0xff]   ;;  %v3373_v0 = vld [vmem:[%s3964_s16 + $0x58c] ss:$16 sps:$4 sm:$0xff]  }
 0x1be   : > { %2228 = vmatprep.subr.bf16.mxu0 %v3286_v1  ;;  %2392 = vmatprep.subr.bf16.mxu1 %v3289_v2  ;;  %v3368_v1 = vld [vmem:[%s3964_s16 + $0x580] ss:$16 sps:$4 sm:$0xff]   ;;  %v3371_v2 = vld [vmem:[%s3964_s16 + $0x588] ss:$16 sps:$4 sm:$0xff]  }
 0x1c1   : > { %2229 = vmatpush1.bf16.msra.mxu0 %v3284_v3  ;;  %2393 = vmatpush1.bf16.msra.mxu1 %v3287_v4  ;;  %v3376_v3 = vld [vmem:[%s3964_s16 + $0x5a4] ss:$16 sps:$4 sm:$0xff]   ;;  %v3379_v4 = vld [vmem:[%s3964_s16 + $0x5ac] ss:$16 sps:$4 sm:$0xff]  }
 0x1c2   : > { %2230 = vmatprep.subr.bf16.mxu0 %v3292_v5  ;;  %2394 = vmatprep.subr.bf16.mxu1 %v3295_v7  ;;  %v3374_v5 = vld [vmem:[%s3964_s16 + $0x5a0] ss:$16 sps:$4 sm:$0xff]   ;;  %v3377_v7 = vld [vmem:[%s3964_s16 + $0x5a8] ss:$16 sps:$4 sm:$0xff]  }
 0x1c5   : > { %2231 = vmatpush1.bf16.msra.mxu0 %v3290_v8  ;;  %2395 = vmatpush1.bf16.msra.mxu1 %v3293_v9  ;;  %v3382_v8 = vld [vmem:[%s3964_s16 + $0x5c4] ss:$16 sps:$4 sm:$0xff]   ;;  %v3385_v9 = vld [vmem:[%s3964_s16 + $0x5cc] ss:$16 sps:$4 sm:$0xff]  }
 0x1c6   : > { %2241 = vmatprep.subr.bf16.mxu0 %v3298_v10  ;;  %2405 = vmatprep.subr.bf16.mxu1 %v3301_v13  ;;  %v3380_v10 = vld [vmem:[%s3964_s16 + $0x5c0] ss:$16 sps:$4 sm:$0xff]   ;;  %v3383_v13 = vld [vmem:[%s3964_s16 + $0x5c8] ss:$16 sps:$4 sm:$0xff]  }
 0x1c8   : > { %2233 = vmatmul.mubr.bf16.vlgmr.msra.gmra.mrb[0].mxu0 %v867_v15  ;;  %2397 = vmatmul.mubr.bf16.vlgmr.msra.gmra.mrb[0].mxu1 %v867_v15  ;;  %v3391_v15 = vld [vmem:[%s3964_s16 + $0x5ec] ss:$16 sps:$4 sm:$0xff]  }
 0x1c9   : > { %2242 = vmatpush1.bf16.msra.mxu0 %v3296_v14  ;;  %2406 = vmatpush1.bf16.msra.mxu1 %v3299_v16  ;;  %v3388_v14 = vld [vmem:[%s3964_s16 + $0x5e4] ss:$16 sps:$4 sm:$0xff]   ;;  %v3386_v16 = vld [vmem:[%s3964_s16 + $0x5e0] ss:$16 sps:$4 sm:$0xff]  }
 0x1ca   : > { %2243 = vmatprep.subr.bf16.mxu0 %v3304_v17  ;;  %2407 = vmatprep.subr.bf16.mxu1 %v3307_v18  ;;  %v3389_v17 = vld [vmem:[%s3964_s16 + $0x5e8] ss:$16 sps:$4 sm:$0xff]   ;;  %v3395_v18 = vld [vmem:[%s3964_s16 + $0x604] ss:$16 sps:$4 sm:$0xff]  }
 0x1cb   : > { %2273 = vmatprep.mubr.bf16.mxu0 %v4061_v11  ;;  %2437 = vmatprep.mubr.bf16.mxu1 %v4061_v11  ;;  %v3405_v11 = vld [vmem:[%s3964_s16 + $0x640] ss:$16 sps:$4 sm:$0xff]  }
 0x1cd   : > { %2244 = vmatpush1.bf16.msra.mxu0 %v3302_v19  ;;  %2408 = vmatpush1.bf16.msra.mxu1 %v3305_v20  ;;  %v3398_v19 = vld [vmem:[%s3964_s16 + $0x60c] ss:$16 sps:$4 sm:$0xff]   ;;  %v3393_v20 = vld [vmem:[%s3964_s16 + $0x600] ss:$16 sps:$4 sm:$0xff]  }
 0x1ce   : > { %2245 = vmatprep.subr.bf16.mxu0 %v3310_v6  ;;  %2409 = vmatprep.subr.bf16.mxu1 %v3313_v21  ;;  %v3396_v6 = vld [vmem:[%s3964_s16 + $0x608] ss:$16 sps:$4 sm:$0xff]   ;;  %v3401_v21 = vld [vmem:[%s3964_s16 + $0x624] ss:$16 sps:$4 sm:$0xff]  }
 0x1d1   : > { %2246 = vmatpush1.bf16.msra.mxu0 %v3308_v22  ;;  %2410 = vmatpush1.bf16.msra.mxu1 %v3311_v24  ;;  %v3404_v22 = vld [vmem:[%s3964_s16 + $0x62c] ss:$16 sps:$4 sm:$0xff]   ;;  %v3399_v24 = vld [vmem:[%s3964_s16 + $0x620] ss:$16 sps:$4 sm:$0xff]  }
 0x1d2   : > { %2247 = vmatprep.subr.bf16.mxu0 %v3316_v25  ;;  %2411 = vmatprep.subr.bf16.mxu1 %v3319_v26  ;;  %v3402_v25 = vld [vmem:[%s3964_s16 + $0x628] ss:$16 sps:$4 sm:$0xff]   ;;  %v3407_v26 = vld [vmem:[%s3964_s16 + $0x644] ss:$16 sps:$4 sm:$0xff]  }
 0x1d5   : > { %2248 = vmatpush1.bf16.msra.mxu0 %v3314_v27  ;;  %2412 = vmatpush1.bf16.msra.mxu1 %v3317_v28  ;;  %v3410_v27 = vld [vmem:[%s3964_s16 + $0x64c] ss:$16 sps:$4 sm:$0xff]   ;;  %v3408_v28 = vld [vmem:[%s3964_s16 + $0x648] ss:$16 sps:$4 sm:$0xff]  }
 0x1d6   : > { %2249 = vmatprep.subr.bf16.mxu0 %v3322_v29  ;;  %2413 = vmatprep.subr.bf16.mxu1 %v3325_v30  ;;  %v3413_v29 = vld [vmem:[%s3964_s16 + $0x664] ss:$16 sps:$4 sm:$0xff]   ;;  %v3416_v30 = vld [vmem:[%s3964_s16 + $0x66c] ss:$16 sps:$4 sm:$0xff]  }
 0x1d9   : > { %2250 = vmatpush1.bf16.msra.mxu0 %v3320_v31  ;;  %2414 = vmatpush1.bf16.msra.mxu1 %v3323_v32  ;;  %v3411_v31 = vld [vmem:[%s3964_s16 + $0x660] ss:$16 sps:$4 sm:$0xff]   ;;  %v3414_v32 = vld [vmem:[%s3964_s16 + $0x668] ss:$16 sps:$4 sm:$0xff]  }
 0x1da   : > { %2251 = vmatprep.subr.bf16.mxu0 %v3328_v34  ;;  %2415 = vmatprep.subr.bf16.mxu1 %v3331_v35  ;;  %v3419_v34 = vld [vmem:[%s3964_s16 + $0x684] ss:$16 sps:$4 sm:$0xff]   ;;  %v3422_v35 = vld [vmem:[%s3964_s16 + $0x68c] ss:$16 sps:$4 sm:$0xff]  }
 0x1dd   : > { %2252 = vmatpush1.bf16.msra.mxu0 %v3326_v36  ;;  %2416 = vmatpush1.bf16.msra.mxu1 %v3329_v37  ;;  %v3417_v36 = vld [vmem:[%s3964_s16 + $0x680] ss:$16 sps:$4 sm:$0xff]   ;;  %v3420_v37 = vld [vmem:[%s3964_s16 + $0x688] ss:$16 sps:$4 sm:$0xff]  }
 0x1de   : > { %2253 = vmatprep.subr.bf16.mxu0 %v3334_v38  ;;  %2417 = vmatprep.subr.bf16.mxu1 %v3337_v39  ;;  %v3425_v38 = vld [vmem:[%s3964_s16 + $0x6a4] ss:$16 sps:$4 sm:$0xff]   ;;  %v3428_v39 = vld [vmem:[%s3964_s16 + $0x6ac] ss:$16 sps:$4 sm:$0xff]  }
 0x1e1   : > { %2254 = vmatpush1.bf16.msra.mxu0 %v3332_v40  ;;  %2418 = vmatpush1.bf16.msra.mxu1 %v3335_v41  ;;  %v3423_v40 = vld [vmem:[%s3964_s16 + $0x6a0] ss:$16 sps:$4 sm:$0xff]   ;;  %v3426_v41 = vld [vmem:[%s3964_s16 + $0x6a8] ss:$16 sps:$4 sm:$0xff]  }
 0x1e2   : > { %2255 = vmatprep.subr.bf16.mxu0 %v3340_v42  ;;  %2419 = vmatprep.subr.bf16.mxu1 %v3343_v43  ;;  %v3431_v42 = vld [vmem:[%s3964_s16 + $0x6c4] ss:$16 sps:$4 sm:$0xff]   ;;  %v3434_v43 = vld [vmem:[%s3964_s16 + $0x6cc] ss:$16 sps:$4 sm:$0xff]  }
 0x1e5   : > { %2256 = vmatpush1.bf16.msra.mxu0 %v3338_v44  ;;  %2420 = vmatpush1.bf16.msra.mxu1 %v3341_v45  ;;  %v3429_v44 = vld [vmem:[%s3964_s16 + $0x6c0] ss:$16 sps:$4 sm:$0xff]   ;;  %v3432_v45 = vld [vmem:[%s3964_s16 + $0x6c8] ss:$16 sps:$4 sm:$0xff]  }
 0x1e6   : > { %2257 = vmatprep.subr.bf16.mxu0 %v3346_v46  ;;  %2421 = vmatprep.subr.bf16.mxu1 %v3349_v47  ;;  %v3437_v46 = vld [vmem:[%s3964_s16 + $0x6e4] ss:$16 sps:$4 sm:$0xff]   ;;  %v3440_v47 = vld [vmem:[%s3964_s16 + $0x6ec] ss:$16 sps:$4 sm:$0xff]  }
 0x1e9   : > { %2258 = vmatpush1.bf16.msra.mxu0 %v3344_v48  ;;  %2422 = vmatpush1.bf16.msra.mxu1 %v3347_v49  ;;  %v3435_v48 = vld [vmem:[%s3964_s16 + $0x6e0] ss:$16 sps:$4 sm:$0xff]   ;;  %v3438_v49 = vld [vmem:[%s3964_s16 + $0x6e8] ss:$16 sps:$4 sm:$0xff]  }
 0x1ea   : > { %2259 = vmatprep.subr.bf16.mxu0 %v3352_v50  ;;  %2423 = vmatprep.subr.bf16.mxu1 %v3355_v51  ;;  %v3443_v50 = vld [vmem:[%s3964_s16 + $0x704] ss:$16 sps:$4 sm:$0xff]   ;;  %v3446_v51 = vld [vmem:[%s3964_s16 + $0x70c] ss:$16 sps:$4 sm:$0xff]  }
 0x1ed   : > { %2260 = vmatpush1.bf16.msra.mxu0 %v3350_v52  ;;  %2424 = vmatpush1.bf16.msra.mxu1 %v3353_v53  ;;  %v3441_v52 = vld [vmem:[%s3964_s16 + $0x700] ss:$16 sps:$4 sm:$0xff]   ;;  %v3444_v53 = vld [vmem:[%s3964_s16 + $0x708] ss:$16 sps:$4 sm:$0xff]  }
 0x1ee   : > { %2261 = vmatprep.subr.bf16.mxu0 %v3358_v54  ;;  %2425 = vmatprep.subr.bf16.mxu1 %v3361_v55  ;;  %v3449_v54 = vld [vmem:[%s3964_s16 + $0x724] ss:$16 sps:$4 sm:$0xff]   ;;  %v3452_v55 = vld [vmem:[%s3964_s16 + $0x72c] ss:$16 sps:$4 sm:$0xff]  }
 0x1f1   : > { %2262 = vmatpush1.bf16.msra.mxu0 %v3356_v56  ;;  %2426 = vmatpush1.bf16.msra.mxu1 %v3359_v57  ;;  %v3447_v56 = vld [vmem:[%s3964_s16 + $0x720] ss:$16 sps:$4 sm:$0xff]   ;;  %v3450_v57 = vld [vmem:[%s3964_s16 + $0x728] ss:$16 sps:$4 sm:$0xff]  }
 0x1f2   : > { %2263 = vmatprep.subr.bf16.mxu0 %v3364_v58  ;;  %2427 = vmatprep.subr.bf16.mxu1 %v3367_v59  ;;  %v3455_v58 = vld [vmem:[%s3964_s16 + $0x744] ss:$16 sps:$4 sm:$0xff]   ;;  %v3458_v59 = vld [vmem:[%s3964_s16 + $0x74c] ss:$16 sps:$4 sm:$0xff]  }
 0x1f5   : > { %2264 = vmatpush1.bf16.msra.mxu0 %v3362_v61  ;;  %2428 = vmatpush1.bf16.msra.mxu1 %v3365_v62  ;;  %v3456_v61 = vld [vmem:[%s3964_s16 + $0x748] ss:$16 sps:$4 sm:$0xff]   ;;  %v3461_v62 = vld [vmem:[%s3964_s16 + $0x764] ss:$16 sps:$4 sm:$0xff]  }
 0x1f6   : > { %2265 = vmatprep.subr.bf16.mxu0 %v3370_v63  ;;  %2429 = vmatprep.subr.bf16.mxu1 %v3373_v0  ;;  %v3464_v63 = vld [vmem:[%s3964_s16 + $0x76c] ss:$16 sps:$4 sm:$0xff]   ;;  %v3459_v0 = vld [vmem:[%s3964_s16 + $0x760] ss:$16 sps:$4 sm:$0xff]  }
 0x1f9   : > { %2266 = vmatpush1.bf16.msra.mxu0 %v3368_v1  ;;  %2430 = vmatpush1.bf16.msra.mxu1 %v3371_v2  ;;  %v3462_v1 = vld [vmem:[%s3964_s16 + $0x768] ss:$16 sps:$4 sm:$0xff]   ;;  %v3467_v2 = vld [vmem:[%s3964_s16 + $0x784] ss:$16 sps:$4 sm:$0xff]  }
 0x1fa   : > { %2267 = vmatprep.subr.bf16.mxu0 %v3376_v3  ;;  %2431 = vmatprep.subr.bf16.mxu1 %v3379_v4  ;;  %v3470_v3 = vld [vmem:[%s3964_s16 + $0x78c] ss:$16 sps:$4 sm:$0xff]   ;;  %v3465_v4 = vld [vmem:[%s3964_s16 + $0x780] ss:$16 sps:$4 sm:$0xff]  }
 0x1fd   : > { %2268 = vmatpush1.bf16.msra.mxu0 %v3374_v5  ;;  %2432 = vmatpush1.bf16.msra.mxu1 %v3377_v7  ;;  %v3468_v5 = vld [vmem:[%s3964_s16 + $0x788] ss:$16 sps:$4 sm:$0xff]   ;;  %v3473_v7 = vld [vmem:[%s3964_s16 + $0x7a4] ss:$16 sps:$4 sm:$0xff]  }
 0x1fe   : > { %2269 = vmatprep.subr.bf16.mxu0 %v3382_v8  ;;  %2433 = vmatprep.subr.bf16.mxu1 %v3385_v9  ;;  %v3476_v8 = vld [vmem:[%s3964_s16 + $0x7ac] ss:$16 sps:$4 sm:$0xff]   ;;  %v3471_v9 = vld [vmem:[%s3964_s16 + $0x7a0] ss:$16 sps:$4 sm:$0xff]  }
 0x201   : > { %2270 = vmatpush1.bf16.msra.mxu0 %v3380_v10  ;;  %2434 = vmatpush1.bf16.msra.mxu1 %v3383_v13  ;;  %v3474_v10 = vld [vmem:[%s3964_s16 + $0x7a8] ss:$16 sps:$4 sm:$0xff]   ;;  %v3479_v13 = vld [vmem:[%s3964_s16 + $0x7c4] ss:$16 sps:$4 sm:$0xff]  }
 0x202   : > { %2271 = vmatprep.subr.bf16.mxu0 %v3388_v14  ;;  %2435 = vmatprep.subr.bf16.mxu1 %v3391_v15  ;;  %v3482_v14 = vld [vmem:[%s3964_s16 + $0x7cc] ss:$16 sps:$4 sm:$0xff]   ;;  %v3477_v15 = vld [vmem:[%s3964_s16 + $0x7c0] ss:$16 sps:$4 sm:$0xff]  }
 0x205   : > { %2272 = vmatpush1.bf16.msra.mxu0 %v3386_v16  ;;  %2436 = vmatpush1.bf16.msra.mxu1 %v3389_v17  ;;  %v3480_v16 = vld [vmem:[%s3964_s16 + $0x7c8] ss:$16 sps:$4 sm:$0xff]   ;;  %v3485_v17 = vld [vmem:[%s3964_s16 + $0x7e4] ss:$16 sps:$4 sm:$0xff]  }
 0x206   : > { %2282 = vmatprep.subr.bf16.mxu0 %v3395_v18  ;;  %2446 = vmatprep.subr.bf16.mxu1 %v3398_v19  ;;  %v3488_v18 = vld [vmem:[%s3964_s16 + $0x7ec] ss:$16 sps:$4 sm:$0xff]   ;;  %v3483_v19 = vld [vmem:[%s3964_s16 + $0x7e0] ss:$16 sps:$4 sm:$0xff]  }
 0x208   : > { %2274 = vmatmul.mubr.bf16.vlgmr.msra.gmra.mrb[0].mxu0 %v4064_v12  ;;  %2438 = vmatmul.mubr.bf16.vlgmr.msra.gmra.mrb[0].mxu1 %v4064_v12 }
 0x209   : > { %2283 = vmatpush1.bf16.msra.mxu0 %v3393_v20  ;;  %2447 = vmatpush1.bf16.msra.mxu1 %v3396_v6  ;;  %v3486_v20 = vld [vmem:[%s3964_s16 + $0x7e8] ss:$16 sps:$4 sm:$0xff]   ;;  %v868_v6 = vcombine.high %v4064_v12, %v4064_v12  ;;  %v763_v12 = vld [vmem:[%s308_s3] sm:$0xf] }
 0x20a   : > { %2284 = vmatprep.subr.bf16.mxu0 %v3401_v21  ;;  %2448 = vmatprep.subr.bf16.mxu1 %v3404_v22  ;;  %v774_v21 = vsub.s32 0, %v4018_v33  ;;  %v778_v22 = vsub.s32 1, %v4018_v33 }
 0x20b   : > { %2314 = vmatprep.mubr.bf16.mxu0 %v870_v23  ;;  %2478 = vmatprep.mubr.bf16.mxu1 %v870_v23  ;;  %v782_v23 = vsub.s32 2, %v4018_v33 }
 0x20d   : > { %2285 = vmatpush1.bf16.msra.mxu0 %v3399_v24  ;;  %2449 = vmatpush1.bf16.msra.mxu1 %v3402_v25  ;;  %v765_v24 = vld [vmem:[%s317_s17] sm:$0xf]  ;;  %v786_v25 = vsub.s32 3, %v4018_v33 }
 0x20e   : > { %2286 = vmatprep.subr.bf16.mxu0 %v3407_v26  ;;  %2450 = vmatprep.subr.bf16.mxu1 %v3410_v27  ;;  %v775_v26 = vrot.slane %v765_v24, %v774_v21  ;;  %v779_v27 = vrot.slane %v765_v24, %v778_v22 }
 0x211   : > { %2287 = vmatpush1.bf16.msra.mxu0 %v3405_v11  ;;  %2451 = vmatpush1.bf16.msra.mxu1 %v3408_v28  ;;  %v783_v11 = vrot.slane %v765_v24, %v782_v23  ;;  %v787_v28 = vrot.slane %v765_v24, %v786_v25 }
 0x212   : > { %2288 = vmatprep.subr.bf16.mxu0 %v3413_v29  ;;  %2452 = vmatprep.subr.bf16.mxu1 %v3416_v30  ;;  %v800_v30 = vrot.slane %v763_v12, %v774_v21 }
 0x215   : > { %2289 = vmatpush1.bf16.msra.mxu0 %v3411_v31  ;;  %2453 = vmatpush1.bf16.msra.mxu1 %v3414_v32 }
 0x216   : > { %2290 = vmatprep.subr.bf16.mxu0 %v3419_v34  ;;  %2454 = vmatprep.subr.bf16.mxu1 %v3422_v35  ;;  %v808_v35 = vrot.slane %v763_v12, %v782_v23 }
 0x219   : > { %2291 = vmatpush1.bf16.msra.mxu0 %v3417_v36  ;;  %2455 = vmatpush1.bf16.msra.mxu1 %v3420_v37  ;;  %v804_v37 = vrot.slane %v763_v12, %v778_v22 }
 0x21a   : > { %2292 = vmatprep.subr.bf16.mxu0 %v3425_v38  ;;  %2456 = vmatprep.subr.bf16.mxu1 %v3428_v39  ;;  %v3711_v38 = vmov 1983009808  }
 0x21b   : > { %v2504_v39 = vunpack.c.l.s4 %v3711_v38 }
 0x21d   : > { %2293 = vmatpush1.bf16.msra.mxu0 %v3423_v40  ;;  %2457 = vmatpush1.bf16.msra.mxu1 %v3426_v41  ;;  %v812_v40 = vrot.slane %v763_v12, %v786_v25 }
 0x21e   : > { %2294 = vmatprep.subr.bf16.mxu0 %v3431_v42  ;;  %2458 = vmatprep.subr.bf16.mxu1 %v3434_v43 }
 0x221   : > { %2295 = vmatpush1.bf16.msra.mxu0 %v3429_v44  ;;  %2459 = vmatpush1.bf16.msra.mxu1 %v3432_v45  ;;  %v2505_v44 = vunpack.c.0.s8 %v2504_v39 }
 0x222   : > { %2296 = vmatprep.subr.bf16.mxu0 %v3437_v46  ;;  %2460 = vmatprep.subr.bf16.mxu1 %v3440_v47 }
 0x225   : > { %2297 = vmatpush1.bf16.msra.mxu0 %v3435_v48  ;;  %2461 = vmatpush1.bf16.msra.mxu1 %v3438_v49 }
 0x226   : > { %2298 = vmatprep.subr.bf16.mxu0 %v3443_v50  ;;  %2462 = vmatprep.subr.bf16.mxu1 %v3446_v51 }
 0x229   : > { %2299 = vmatpush1.bf16.msra.mxu0 %v3441_v52  ;;  %2463 = vmatpush1.bf16.msra.mxu1 %v3444_v53  ;;  %v2508_v53 = vsub.s32 %v2505_v44, %v4018_v33 }
 0x22a   : > { %2300 = vmatprep.subr.bf16.mxu0 %v3449_v54  ;;  %2464 = vmatprep.subr.bf16.mxu1 %v3452_v55 }
 0x22d   : > { %2301 = vmatpush1.bf16.msra.mxu0 %v3447_v56  ;;  %2465 = vmatpush1.bf16.msra.mxu1 %v3450_v57  ;;  %v2492_v57 = vld [vmem:[%s2491_s20] sm:$0xff] }
 0x22e   : > { %2302 = vmatprep.subr.bf16.mxu0 %v3455_v58  ;;  %2466 = vmatprep.subr.bf16.mxu1 %v3458_v59  ;;  %v2495_v58 = vld [vmem:[%s2494_s18] sm:$0xff] }
 0x231   : > { %2303 = vmatpush1.bf16.msra.mxu0 %v3453_v60  ;;  %2467 = vmatpush1.bf16.msra.mxu1 %v3456_v61 }
 0x232   : > { %2304 = vmatprep.subr.bf16.mxu0 %v3461_v62  ;;  %2468 = vmatprep.subr.bf16.mxu1 %v3464_v63 }
 0x235   : > { %2305 = vmatpush1.bf16.msra.mxu0 %v3459_v0  ;;  %2469 = vmatpush1.bf16.msra.mxu1 %v3462_v1  ;;  %v2496_v0 = vsub.f32 %v2492_v57, %v2495_v58 }
 0x236   : > { %2306 = vmatprep.subr.bf16.mxu0 %v3467_v2  ;;  %2470 = vmatprep.subr.bf16.mxu1 %v3470_v3 }
 0x239   : > { %2307 = vmatpush1.bf16.msra.mxu0 %v3465_v4  ;;  %2471 = vmatpush1.bf16.msra.mxu1 %v3468_v5  ;;  %v2520_v4 = vld [vmem:[#allocation3] sm:$0xff] }
 0x23a   : > { %2308 = vmatprep.subr.bf16.mxu0 %v3473_v7  ;;  %2472 = vmatprep.subr.bf16.mxu1 %v3476_v8  ;;  %v769_v29 = vpop.permute.xlu0 %768 }
 0x23b   : > { %v792_v31 = vmul.f32 %v775_v26, %v769_v29  ;;  %v793_v32 = vmul.f32 %v779_v27, %v769_v29  ;;  %v794_v34 = vmul.f32 %v783_v11, %v769_v29  ;;  %v795_v36 = vmul.f32 %v787_v28, %v769_v29 }
 0x23d   : > { %2309 = vmatpush1.bf16.msra.mxu0 %v3471_v9  ;;  %2473 = vmatpush1.bf16.msra.mxu1 %v3474_v10  ;;  %v817_v41 = vadd.f32 %v800_v30, %v792_v31  ;;  %v819_v42 = vadd.f32 %v808_v35, %v794_v34  ;;  %v818_v43 = vadd.f32 %v804_v37, %v793_v32 }
 0x23e   : > { %2310 = vmatprep.subr.bf16.mxu0 %v3479_v13  ;;  %2474 = vmatprep.subr.bf16.mxu1 %v3482_v14  ;;  %v820_v45 = vadd.f32 %v812_v40, %v795_v36 }
 0x241   : > { %2311 = vmatpush1.bf16.msra.mxu0 %v3477_v15  ;;  %2475 = vmatpush1.bf16.msra.mxu1 %v3480_v16 }
 0x242   : > { %2312 = vmatprep.subr.bf16.mxu0 %v3485_v17  ;;  %2476 = vmatprep.subr.bf16.mxu1 %v3488_v18 }
 0x245   : > { %2313 = vmatpush1.bf16.msra.mxu0 %v3483_v19  ;;  %2477 = vmatpush1.bf16.msra.mxu1 %v3486_v20 }
 0x248   : > { %2315 = vmatmul.mubr.bf16.vlgmr.msra.gmra.mrb[0].mxu0 %v868_v6  ;;  %2479 = vmatmul.mubr.bf16.vlgmr.msra.gmra.mrb[0].mxu1 %v868_v6 }
 0x31b   : > { %v2316_v46 = vpop.f32.mrb[0].mxu0  ;;  %v2480_v47 = vpop.f32.mrb[0].mxu1 }
 0x31c   : > { %v2984_v48 = vadd.f32 %v2316_v46, %v817_v41  ;;  %v2986_v49 = vadd.f32 %v2480_v47, %v819_v42  ;;  %v2318_v50 = vpop.f32.mrb[1].mxu0  ;;  %v2482_v51 = vpop.f32.mrb[1].mxu1 }
 0x31d   : > { %v2985_v52 = vadd.f32 %v2318_v50, %v818_v43  ;;  %v2987_v54 = vadd.f32 %v2482_v51, %v820_v45  ;;  %v2320_v55 = vpop.f32.mrb[2].mxu0  ;;  %v2484_v56 = vpop.f32.mrb[2].mxu1 }
 0x31e   : > { %v2321_v59 = vpop.f32.mrb[3].mxu0  ;;  %v2485_v60 = vpop.f32.mrb[3].mxu1 }
 0x31f   : > { %v2501_v61 = vcombine.low %v2984_v48, %v2985_v52  ;;  %v2502_v62 = vcombine.low %v2986_v49, %v2987_v54 }
 0x321   : > { %v2509_v63 = vrot.slane %v2501_v61, %v2508_v53  ;;  %v2516_v1 = vrot.slane %v2502_v62, %v2508_v53 }
 0x323   : > { %v2517_v2 = vcombine.low %v2509_v63, %v2516_v1 }
 0x325   : > { %v2519_v3 = vsub.f32 %v2496_v0, %v2517_v2  ;;  %2527 = sbr.rel (%p2976_p2) target bundleno = 1037 (0x40d), region = 72 }
 0x327   : > { %v2521_v5 = vmul.f32 %v2519_v3, %v2519_v3 }
 0x329   : > { %v2522_v7 = vadd.f32 %v2521_v5, %v2520_v4 }
 0x32b   : > { %2523 = vst [vmem:[#allocation3] sm:$0xff] %v2522_v7 }
 0x332   : > { %v2528_v33 = vld [vmem:[#allocation3] sm:$0xff] }
 0x333   : > { %v2530_v8 = vcombine.high %v2528_v33, %v2528_v33  ;;  %v2537_v9 = vrot.slane %v2528_v33, %v2508_v53 }
 0x335   : > { %v2544_v10 = vrot.slane %v2530_v8, %v2508_v53  ;;  %v2545_v13 = vcombine.high %v2537_v9, %v2537_v9  ;;  %v2552_v14 = vsel %vm2551_vm0, %v2537_v9, 0.0 }
 0x337   : > { %v2546_v15 = vcombine.high %v2544_v10, %v2544_v10  ;;  %v2553_v16 = vsel %vm2551_vm0, %v2545_v13, 0.0  ;;  %v2555_v17 = vsel %vm2551_vm0, %v2544_v10, 0.0 }
 0x338   : > { %v2554_v18 = vadd.f32 %v2553_v16, %v2552_v14 }
 0x339   : > { %v2557_v19 = vsel %vm2551_vm0, %v2546_v15, 0.0 }
 0x33a   : > { %v2556_v20 = vadd.f32 %v2555_v17, %v2554_v18 }
 0x33c   : > { %v2558_v6 = vadd.f32 %v2557_v19, %v2556_v20 }
 0x33e   : > { %2559 = vadd.xlane.f32.xlu0 %v2558_v6 }
 0x3cb   : > { %v2560_v21 = vpop.xlane.xlu0 %2559 }
 0x3cc   : > { %v2561_v22 = vrot.slane %v2560_v21, 4 }
 0x3ce   : > { %v2562_v23 = vadd.f32 %v2561_v22, %v2560_v21 }
 0x3d0   : > { %v2563_v24 = vrot.slane %v2562_v23, 2 }
 0x3d2   : > { %v2564_v25 = vadd.f32 %v2563_v24, %v2562_v23 }
 0x3d4   : > { %v2565_v26 = vrot.slane %v2564_v25, 1 }
 0x3d6   : > { %v2566_v27 = vadd.f32 %v2565_v26, %v2564_v25 }
 0x3d8   : > { %3012 = vpush %v2566_v27 }
 0x409   : > { %s3013_s27 = spop %3012 }
 0x40a   : > { %s2570_s21 = smul.f32 0.00048828125, %s3013_s27 }
 0x40c   : > { %2572 = sst [smem:[#allocation12]] %s2570_s21 }
 0x40d PF: > { %p3054_p4 = scmp.eq.s32.totalorder %s3767_s25, 1  ;;  %s3636_s13 = scalar_lea.hbm %s4310_s6, 16 }
 0x40e   : > { %p3637_p7 = scmp.ne.s32.totalorder %s4310_s6, %s3636_s13  ;;  %p3642_p5 = scmp.lt.u32.totalorder %s3636_s13, %s4310_s6 }
 0x410   : > { %p3638_p8 = pnand %p3637_p7, %p3054_p4 }
 0x412   : > { %p3639_p9 = pneg %p3638_p8 }
 0x414   : > { %p3644_p12 = pnand %p3642_p5, %p3639_p9 }
 0x416   : > { %3647 = shalt.err (!%p3644_p12)
}
 0x417   : > { %s3712_s24 = smov [#allocation12]  }
 0x418   : > { %3029 = dma.smem_to_hbm (%p3054_p4), %s3712_s24, 16, %s4310_s6, [#allocation6]  }
 0x419   : > { %3677 = dma.done.wait (%p3054_p4), [#allocation6], 16  }
 0x41a   : > { %3679 = vsyncadd (%p3054_p4), [#allocation6], 4294967280 }
 0x41b   : > { %2586 = sfence }
 0x41c PF: > { %p16_p11 = scmp.ge.s32.totalorder %s3770_s26, 4   ;;  %s4345_s21 = smov %s3686_s22 }
 0x41d   : > { %s4346_s22 = smov %s3690_s23  ;;  %s4347_s23 = smov %s3780_s29 }
 0x41e   : > { %s4348_s24 = smov %s3770_s26  ;;  %18 = sbr.rel (!%p16_p11) target bundleno = 7 (0x7), region = 121 }
 0x425   :  { %2592 = vsyncpa [#allocation5], 1 }
 0x426   :  { %2594 = vsyncpa [#allocation5 + $0x1], 1 }
 0x427   :  { %2595 = vsyncpa [#allocation8], 1 }
 0x428   :  { %2596 = vsyncpa [#allocation6], 1 }
 0x429   :  { %2598 = vsyncpa [#allocation6 + $0x1], 1 }

</bundles_post_ra>
